<compile_context>
chip_gen: v6e
topology: v6e:2x2x1
jax: 0.10.0
libtpu: 0.0.40
codegen_flags: <defaults>
</compile_context>

<pallas_src>
import functools
import math

import jax
import jax.numpy as jnp
from jax.experimental import pallas as pl
from jax.experimental.pallas import tpu as pltpu


LANE = 128  # TPU lane width (used for VMEM sizing estimates only).


# ---------------------------------------------------------------------------
# In-kernel building blocks
# ---------------------------------------------------------------------------
def _tap_lhs(x, is_first, is_last):
    """Fused-tap LHS [x[l-1] | x[l] | x[l+1]] for a k=3 'same' conv.

    x:        (R, C) f32 rows; consecutive L rows form one independent sequence.
    is_first: (R, 1) bool, True at each sequence start.
    is_last:  (R, 1) bool, True at each sequence end.
    The roll never leaks across the sequences packed into this tile because the
    boundary rows are masked to zero.
    """
    rows = x.shape[0]
    x_prev = jnp.where(is_first, 0.0, pltpu.roll(x, 1, axis=0))
    x_next = jnp.where(is_last, 0.0, pltpu.roll(x, rows - 1, axis=0))
    return jnp.concatenate([x_prev, x, x_next], axis=1)


def _char_cnn_kernel(feat_ref,
                     wp_ref, bp_ref,
                     w0a_ref, w0b_ref, b0_ref,
                     w1_ref, b1_ref, w2_ref, b2_ref, w3_ref, b3_ref,
                     wh1_ref, bh1_ref, wh2_ref, bh2_ref,
                     o_ref, *, seq_len, n_probs, compute_dtype):
    """Fully fused CharCNN forward for one tile of flattened (batch, pos) rows."""
    rows = feat_ref.shape[0]
    # Each block holds whole sequences (rows = bb * seq_len), so the position
    # within a sequence is recoverable from an iota -- no pos input stream.
    pos = jax.lax.broadcasted_iota(jnp.int32, (rows, 1), 0) % seq_len
    is_first = pos == 0
    is_last = pos == seq_len - 1

    feat = feat_ref[...]                      # (rows, 2M + Dc + Ds) f32
    probs = feat[:, :n_probs]                 # stacked start/end model probs
    char_sent = feat[:, n_probs:]             # [char_emb | sentiment_emb]

    def conv(x, w_ref, b_ref):
        # Conv1d(k=3, pad=1) + folded eval-BN + ReLU as one MXU matmul.
        lhs = _tap_lhs(x, is_first, is_last).astype(compute_dtype)
        y = jnp.dot(lhs, w_ref[...], preferred_element_type=jnp.float32)
        return jnp.maximum(y + b_ref[...], 0.0)      # bias/ReLU stay f32

    # probs_cnn on the stacked start/end model probabilities.
    x = conv(probs, wp_ref, bp_ref)                  # (rows, cnn_dim)

    # cnn[0]: conv over concat([probs_emb, char_emb, sentiment_emb]) realized as
    # a K-split (no in-kernel feature concat).
    y = jnp.dot(_tap_lhs(x, is_first, is_last).astype(compute_dtype),
                w0a_ref[...], preferred_element_type=jnp.float32)
    y = y + jnp.dot(_tap_lhs(char_sent, is_first, is_last).astype(compute_dtype),
                    w0b_ref[...], preferred_element_type=jnp.float32)
    x = jnp.maximum(y + b0_ref[...], 0.0)            # (rows, E)

    # cnn[1..3]
    for w_ref, b_ref in ((w1_ref, b1_ref), (w2_ref, b2_ref), (w3_ref, b3_ref)):
        x = conv(x, w_ref, b_ref)                    # -> (rows, 8E)

    # Logits head: Linear(8E -> E) + ReLU + Linear(E -> 2).
    h = jnp.dot(x.astype(compute_dtype), wh1_ref[...],
                preferred_element_type=jnp.float32) + bh1_ref[...]
    h = jnp.maximum(h, 0.0)
    o = jnp.dot(h.astype(compute_dtype), wh2_ref[...],
                preferred_element_type=jnp.float32) + bh2_ref[...]
    o_ref[...] = o.astype(o_ref.dtype)               # (rows, 2) store


# ---------------------------------------------------------------------------
# Tile selection (rows per grid step)
# ---------------------------------------------------------------------------
def _choose_batch_tile(B, L, c_in_total, conv_in, conv_out, compute_dtype,
                       act_vmem_budget_bytes):
    """Pick bb (sequences per grid step); returns (bb, per_row_vmem_estimate)."""
    pad = lambda c: -(-c // LANE) * LANE
    cd = jnp.dtype(compute_dtype).itemsize
    per_row = 4 * 2 * pad(c_in_total)            # input block, f32, double-buffered
    per_row += 4 * 2 * LANE                      # output block (lane-padded in VMEM), db
    per_row += cd * 3 * pad(max(conv_in))        # widest fused-tap LHS
    per_row += 4 * (pad(max(conv_out)) + pad(max(conv_in)))  # live f32 activations
    rows_cap = max(L, act_vmem_budget_bytes // max(per_row, 1))
    # 512-2048 rows/step amortizes the ~0.35us per-step overhead and feeds the
    # MXU a big M (the only free matmul dim here).
    target_rows = min(2048, rows_cap)
    bb = max(1, min(B, target_rows // L)) if L <= target_rows else 1
    # v7x megacore: prefer >=2 grid steps when there is enough work to split.
    if bb >= B and B > 1 and B * L >= 1024:
        bb = -(-B // 2)
    # (8,128) rule: block sublane count (bb*L) must be a multiple of 8.
    align = 8 // math.gcd(L, 8)
    bb = max(align, (bb // align) * align)
    return bb, per_row


# ---------------------------------------------------------------------------
# Forward wrapper (cheap glue in XLA, everything hot in one Pallas kernel)
# ---------------------------------------------------------------------------
def char_cnn_forward(params, start_probs, end_probs, char_ids, sentiment_ids,
                     compute_dtype=jnp.bfloat16):
    """Eval-mode CharCNN forward. Returns (start_logits, end_logits), each (B, L)."""
    B, _, L = start_probs.shape

    # --- tiny XLA-side glue: embedding gathers + ONE lane-dense activation stream
    probs_nlc = jnp.transpose(
        jnp.concatenate([start_probs, end_probs], axis=1), (0, 2, 1))      # (B,L,2M)
    char_emb = jnp.take(params["char_emb"], char_ids, axis=0)              # (B,L,Dc)
    sent_emb = jnp.take(params["sent_emb"], sentiment_ids, axis=0)         # (B,Ds)
    sent_rows = jnp.broadcast_to(sent_emb[:, None, :], (B, L, sent_emb.shape[-1]))
    feat = jnp.concatenate([probs_nlc, char_emb, sent_rows],
                           axis=-1).astype(jnp.float32)                    # (B,L,C)
    n_probs = probs_nlc.shape[-1]
    c_total = feat.shape[-1]
    feat_flat = feat.reshape(B * L, c_total)

    # --- BN folding + tap-fused weight packing (constant-folded under jit) ---
    def fold(blk):
        w = blk["w"] * blk["scale"][None, None, :]                   # (3, Cin, Cout)
        b = (blk["b"] * blk["scale"] + blk["shift"]).reshape(1, -1)  # (1, Cout) f32
        return w, b.astype(jnp.float32)

    wp3, bp = fold(params["probs_cnn"])
    cnn_dim = wp3.shape[-1]
    wp = wp3.reshape(-1, cnn_dim).astype(compute_dtype)              # (3*2M, cnn_dim)

    w03, b0 = fold(params["cnn"][0])
    w0a = w03[:, :cnn_dim, :].reshape(3 * cnn_dim, -1).astype(compute_dtype)
    w0b = w03[:, cnn_dim:, :].reshape(
        3 * (w03.shape[1] - cnn_dim), -1).astype(compute_dtype)

    rest = [fold(blk) for blk in params["cnn"][1:]]
    rest_w = [w.reshape(w.shape[0] * w.shape[1], w.shape[2]).astype(compute_dtype)
              for w, _ in rest]
    rest_b = [b for _, b in rest]

    e = params["w1"].shape[1]
    wh1 = params["w1"].astype(compute_dtype)                         # (8E, E)
    bh1 = params["b1"].reshape(1, e).astype(jnp.float32)
    wh2 = params["w2"].astype(compute_dtype)                         # (E, 2)
    bh2 = params["b2"].reshape(1, 2).astype(jnp.float32)

    conv_in = [wp3.shape[1], w03.shape[1]] + [w.shape[1] for w, _ in rest]
    conv_out = [cnn_dim, w03.shape[2]] + [w.shape[2] for w, _ in rest]

    # --- row tile: large, VMEM-bounded, whole sequences per block -----------
    act_budget = 24 << 20          # conservative so the kernel also fits v7x (64 MiB)
    bb, per_row_vmem = _choose_batch_tile(B, L, c_total, conv_in, conv_out,
                                          compute_dtype, act_budget)
    n_steps = -(-B // bb)
    padded_B = n_steps * bb
    rows = padded_B * L
    r = bb * L
    if padded_B != B:              # pad with whole fake sequences; results discarded
        feat_flat = jnp.pad(feat_flat, ((0, (padded_B - B) * L), (0, 0)))

    weights = [wp, bp, w0a, w0b, b0,
               rest_w[0], rest_b[0], rest_w[1], rest_b[1], rest_w[2], rest_b[2],
               wh1, bh1, wh2, bh2]

    def _wspec(w):
        # Weights never change across grid steps: constant index_map + a single
        # (non-double-buffered) VMEM buffer keeps them resident and halves VMEM.
        return pl.BlockSpec(w.shape, lambda i: (0,) * w.ndim,
                            pipeline_mode=pl.Buffered(1))

    in_specs = ([pl.BlockSpec((r, c_total), lambda i: (i, 0))]
                + [_wspec(w) for w in weights])
    out_spec = pl.BlockSpec((r, 2), lambda i: (i, 0))

    # --- explicit VMEM limit: resident weights + per-step activation buffers --
    weight_bytes = sum(int(w.size) * w.dtype.itemsize for w in weights)
    vmem_limit = int(weight_bytes + r * per_row_vmem + (8 << 20))
    vmem_limit = max(32 << 20, min(vmem_limit, 64 << 20))

    # --- advisory cost estimate ----------------------------------------------
    mm_ws = [wp, w0a, w0b] + rest_w + [wh1, wh2]
    flops = 2 * rows * sum(int(w.shape[0]) * int(w.shape[1]) for w in mm_ws)
    bytes_accessed = int(feat_flat.size) * 4 + weight_bytes + rows * 2 * 4
    cost = pl.CostEstimate(flops=int(flops), transcendentals=0,
                           bytes_accessed=int(bytes_accessed))

    out = pl.pallas_call(
        functools.partial(_char_cnn_kernel, seq_len=L, n_probs=n_probs,
                          compute_dtype=compute_dtype),
        out_shape=jax.ShapeDtypeStruct((rows, 2), jnp.float32),
        grid=(n_steps,),
        in_specs=in_specs,
        out_specs=out_spec,
        compiler_params=pltpu.CompilerParams(
            dimension_semantics=("parallel",),
            vmem_limit_bytes=vmem_limit),
        cost_estimate=cost,
    )(feat_flat, *weights)

    out = out[:B * L]
    start_logits = out[:, 0].reshape(B, L)
    end_logits = out[:, 1].reshape(B, L)
    return start_logits, end_logits


# ---------------------------------------------------------------------------
# Parameter construction (deterministic, synthetic)
# ---------------------------------------------------------------------------
def make_conv_block_params(key, cin, cout, k=3):
    ks = jax.random.split(key, 6)
    fan = cin * k
    w = jax.random.normal(ks[0], (k, cin, cout), jnp.float32) / jnp.sqrt(fan)
    b = 0.1 * jax.random.normal(ks[1], (cout,), jnp.float32)
    gamma = 1.0 + 0.1 * jax.random.normal(ks[2], (cout,), jnp.float32)
    beta = 0.1 * jax.random.normal(ks[3], (cout,), jnp.float32)
    rmean = 0.1 * jax.random.normal(ks[4], (cout,), jnp.float32)
    rvar = 1.0 + 0.2 * jax.nn.softplus(jax.random.normal(ks[5], (cout,), jnp.float32))
    eps = 1e-5
    scale = gamma / jnp.sqrt(rvar + eps)   # eval BN scale/shift (folded later)
    shift = beta - rmean * scale
    return dict(w=w, b=b, scale=scale, shift=shift)


def make_params(key, char_vocab_size, char_embed_dim, n_models, cnn_dim,
                sentiment_dim, encode_size):
    keys = jax.random.split(key, 10)
    p = {}
    p["char_emb"] = 0.5 * jax.random.normal(
        keys[0], (char_vocab_size, char_embed_dim), jnp.float32)
    p["sent_emb"] = 0.5 * jax.random.normal(
        keys[1], (3, sentiment_dim), jnp.float32)
    p["probs_cnn"] = make_conv_block_params(keys[2], 2 * n_models, cnn_dim)
    c_in = char_embed_dim + cnn_dim + sentiment_dim
    dims = [c_in, encode_size, 2 * encode_size, 4 * encode_size, 8 * encode_size]
    p["cnn"] = [make_conv_block_params(keys[3 + i], dims[i], dims[i + 1])
                for i in range(4)]
    e8 = 8 * encode_size
    p["w1"] = jax.random.normal(keys[7], (e8, encode_size), jnp.float32) / jnp.sqrt(e8)
    p["b1"] = 0.1 * jax.random.normal(keys[8], (encode_size,), jnp.float32)
    p["w2"] = jax.random.normal(keys[9], (encode_size, 2), jnp.float32) / jnp.sqrt(encode_size)
    p["b2"] = jnp.zeros((2,), jnp.float32)
    return p


# ---------------------------------------------------------------------------
# Pure-JAX reference (mirrors torch NCW semantics) for correctness check
# ---------------------------------------------------------------------------
def _ref_conv_block(x_ncl, blk):
    w_oik = jnp.transpose(blk["w"], (2, 1, 0))     # (Cout, Cin, K)
    y = jax.lax.conv_general_dilated(
        x_ncl, w_oik, window_strides=(1,), padding=((1, 1),),
        dimension_numbers=("NCH", "OIH", "NCH"),
        precision=jax.lax.Precision.HIGHEST)
    y = y + blk["b"][None, :, None]
    y = y * blk["scale"][None, :, None] + blk["shift"][None, :, None]
    return jnp.maximum(y, 0.0)


def char_cnn_reference(params, start_probs, end_probs, char_ids, sentiment_ids):
    B, _, L = start_probs.shape
    probs = jnp.concatenate([start_probs, end_probs], axis=1)          # (B, 2M, L)
    probs_emb = jnp.transpose(_ref_conv_block(probs, params["probs_cnn"]), (0, 2, 1))
    char_emb = jnp.take(params["char_emb"], char_ids, axis=0)
    sent_emb = jnp.take(params["sent_emb"], sentiment_ids, axis=0)
    sent_emb = jnp.broadcast_to(sent_emb[:, None, :], (B, L, sent_emb.shape[-1]))
    emb = jnp.transpose(
        jnp.concatenate([probs_emb, char_emb, sent_emb], axis=-1), (0, 2, 1))
    feat = emb
    for blk in params["cnn"]:
        feat = _ref_conv_block(feat, blk)
    feat = jnp.transpose(feat, (0, 2, 1))                              # (B, L, 8E)
    h = jnp.maximum(feat @ params["w1"] + params["b1"], 0.0)
    logits = h @ params["w2"] + params["b2"]
    return logits[:, :, 0], logits[:, :, 1]


# ---------------------------------------------------------------------------
if __name__ == "__main__":
    # Small, module-consistent shapes.
    B = 2
    n_models = 2
    seq_len = 32
    char_vocab_size = 50
    char_embed_dim = 16
    cnn_dim = 16
    sentiment_dim = 8
    encode_size = 16
    kernel_size = 3   # must be 3 (see ConvBlock arg-ordering note above)

    key = jax.random.PRNGKey(0)
    k_par, k_sp, k_ep, k_ci, k_si = jax.random.split(key, 5)

    params = make_params(k_par, char_vocab_size, char_embed_dim, n_models,
                         cnn_dim, sentiment_dim, encode_size)

    start_probs = jax.nn.softmax(
        jax.random.normal(k_sp, (B, n_models, seq_len), jnp.float32), axis=-1)
    end_probs = jax.nn.softmax(
        jax.random.normal(k_ep, (B, n_models, seq_len), jnp.float32), axis=-1)
    char_ids = jax.random.randint(k_ci, (B, seq_len), 0, char_vocab_size)
    sentiment_ids = jax.random.randint(k_si, (B,), 0, 3)

    ref_start, ref_end = char_cnn_reference(
        params, start_probs, end_probs, char_ids, sentiment_ids)

    # f32 compute path: tight check against the pure-JAX reference of the torch model.
    fwd_f32 = jax.jit(functools.partial(char_cnn_forward, params,
                                        compute_dtype=jnp.float32))
    s32, e32 = fwd_f32(start_probs, end_probs, char_ids, sentiment_ids)
    jax.block_until_ready((s32, e32))
    assert s32.shape == (B, seq_len) and e32.shape == (B, seq_len)
    assert jnp.allclose(s32, ref_start, rtol=2e-3, atol=2e-3)
    assert jnp.allclose(e32, ref_end, rtol=2e-3, atol=2e-3)

    # Default bf16 matmul-operand path (MXU density on v5e/v6e/v7x):
    # loose-tolerance check against the same reference.
    fwd = jax.jit(functools.partial(char_cnn_forward, params))
    s16, e16 = fwd(start_probs, end_probs, char_ids, sentiment_ids)
    jax.block_until_ready((s16, e16))
    assert s16.shape == (B, seq_len) and e16.shape == (B, seq_len)
    assert bool(jnp.all(jnp.isfinite(s16))) and bool(jnp.all(jnp.isfinite(e16)))
    err = float(jnp.max(jnp.abs(jnp.stack([s16 - ref_start, e16 - ref_end]))))
    scale = float(jnp.max(jnp.abs(jnp.stack([ref_start, ref_end])))) + 1e-6
    assert err <= 0.1 * scale + 0.05, (err, scale)

    print("KERNEL_OK")
</pallas_src>

<mosaic_0001>
module attributes {stable_mosaic.version = 11 : i64} {
  func.func @_char_cnn_kernel(%arg0: i32, %arg1: memref<64x28xf32, #tpu.memory_space<vmem>>, %arg2: memref<12x16xf32, #tpu.memory_space<vmem>>, %arg3: memref<1x16xf32, #tpu.memory_space<vmem>>, %arg4: memref<48x16xf32, #tpu.memory_space<vmem>>, %arg5: memref<72x16xf32, #tpu.memory_space<vmem>>, %arg6: memref<1x16xf32, #tpu.memory_space<vmem>>, %arg7: memref<48x32xf32, #tpu.memory_space<vmem>>, %arg8: memref<1x32xf32, #tpu.memory_space<vmem>>, %arg9: memref<96x64xf32, #tpu.memory_space<vmem>>, %arg10: memref<1x64xf32, #tpu.memory_space<vmem>>, %arg11: memref<192x128xf32, #tpu.memory_space<vmem>>, %arg12: memref<1x128xf32, #tpu.memory_space<vmem>>, %arg13: memref<128x16xf32, #tpu.memory_space<vmem>>, %arg14: memref<1x16xf32, #tpu.memory_space<vmem>>, %arg15: memref<16x2xf32, #tpu.memory_space<vmem>>, %arg16: memref<1x2xf32, #tpu.memory_space<vmem>>, %arg17: memref<64x2xf32, #tpu.memory_space<vmem>>) attributes {dimension_semantics = [#tpu.dimension_semantics<parallel>], iteration_bounds = array<i64: 1>, scalar_prefetch = 0 : i64, scratch_operands = 0 : i64, tpu.core_type = #tpu.core_type<tc>, window_params = [{transform_indices = @transform_0, window_bounds = array<i64: 64, 28>}, {pipeline_mode = #tpu.pipeline_mode<synchronous>, transform_indices = @transform_1, window_bounds = array<i64: 12, 16>}, {pipeline_mode = #tpu.pipeline_mode<synchronous>, transform_indices = @transform_2, window_bounds = array<i64: 1, 16>}, {pipeline_mode = #tpu.pipeline_mode<synchronous>, transform_indices = @transform_3, window_bounds = array<i64: 48, 16>}, {pipeline_mode = #tpu.pipeline_mode<synchronous>, transform_indices = @transform_4, window_bounds = array<i64: 72, 16>}, {pipeline_mode = #tpu.pipeline_mode<synchronous>, transform_indices = @transform_5, window_bounds = array<i64: 1, 16>}, {pipeline_mode = #tpu.pipeline_mode<synchronous>, transform_indices = @transform_6, window_bounds = array<i64: 48, 32>}, {pipeline_mode = #tpu.pipeline_mode<synchronous>, transform_indices = @transform_7, window_bounds = array<i64: 1, 32>}, {pipeline_mode = #tpu.pipeline_mode<synchronous>, transform_indices = @transform_8, window_bounds = array<i64: 96, 64>}, {pipeline_mode = #tpu.pipeline_mode<synchronous>, transform_indices = @transform_9, window_bounds = array<i64: 1, 64>}, {pipeline_mode = #tpu.pipeline_mode<synchronous>, transform_indices = @transform_10, window_bounds = array<i64: 192, 128>}, {pipeline_mode = #tpu.pipeline_mode<synchronous>, transform_indices = @transform_11, window_bounds = array<i64: 1, 128>}, {pipeline_mode = #tpu.pipeline_mode<synchronous>, transform_indices = @transform_12, window_bounds = array<i64: 128, 16>}, {pipeline_mode = #tpu.pipeline_mode<synchronous>, transform_indices = @transform_13, window_bounds = array<i64: 1, 16>}, {pipeline_mode = #tpu.pipeline_mode<synchronous>, transform_indices = @transform_14, window_bounds = array<i64: 16, 2>}, {pipeline_mode = #tpu.pipeline_mode<synchronous>, transform_indices = @transform_15, window_bounds = array<i64: 1, 2>}, {transform_indices = @transform_16, window_bounds = array<i64: 64, 2>}]} {
    %0 = tpu.iota {dimensions = array<i32: 0>} : vector<64x1xi32>
    %c32_i32 = arith.constant 32 : i32
    %c0_i32 = arith.constant 0 : i32
    %1 = arith.cmpi eq, %c32_i32, %c0_i32 : i32
    %c1_i32 = arith.constant 1 : i32
    %2 = arith.select %1, %c1_i32, %c32_i32 : i32
    %3 = vector.broadcast %2 : i32 to vector<64x1xi32>
    %4 = arith.remsi %0, %3 : vector<64x1xi32>
    %c0_i32_0 = arith.constant 0 : i32
    %5 = vector.broadcast %c0_i32_0 : i32 to vector<64x1xi32>
    %6 = arith.cmpi ne, %4, %5 : vector<64x1xi32>
    %c0_i32_1 = arith.constant 0 : i32
    %7 = vector.broadcast %c0_i32_1 : i32 to vector<64x1xi32>
    %8 = arith.cmpi slt, %4, %7 : vector<64x1xi32>
    %c0_i32_2 = arith.constant 0 : i32
    %9 = arith.cmpi slt, %2, %c0_i32_2 : i32
    %10 = vector.broadcast %9 : i1 to vector<64x1xi1>
    %11 = vector.broadcast %10 : vector<64x1xi1> to vector<64x1xi1>
    %12 = arith.xori %8, %11 : vector<64x1xi1>
    %13 = arith.andi %12, %6 : vector<64x1xi1>
    %14 = vector.broadcast %2 : i32 to vector<64x1xi32>
    %15 = arith.addi %4, %14 : vector<64x1xi32>
    %16 = arith.select %13, %15, %4 : vector<64x1xi1>, vector<64x1xi32>
    %c0_i32_3 = arith.constant 0 : i32
    %17 = vector.broadcast %c0_i32_3 : i32 to vector<64x1xi32>
    %18 = arith.cmpi eq, %16, %17 : vector<64x1xi32>
    %c31_i32 = arith.constant 31 : i32
    %19 = vector.broadcast %c31_i32 : i32 to vector<64x1xi32>
    %20 = arith.cmpi eq, %16, %19 : vector<64x1xi32>
    %c0 = arith.constant 0 : index
    %c0_4 = arith.constant 0 : index
    %21 = vector.load %arg1[%c0, %c0_4] : memref<64x28xf32, #tpu.memory_space<vmem>>, vector<64x28xf32>
    %22 = vector.extract_strided_slice %21 {offsets = [0, 0], sizes = [64, 4], strides = [1, 1]} : vector<64x28xf32> to vector<64x4xf32>
    %23 = vector.extract_strided_slice %21 {offsets = [0, 4], sizes = [64, 24], strides = [1, 1]} : vector<64x28xf32> to vector<64x24xf32>
    %c1_i32_5 = arith.constant 1 : i32
    %24 = tpu.dynamic_rotate %22 by %c1_i32_5 dim 0 : vector<64x4xf32>, i32 -> vector<64x4xf32>
    %cst = arith.constant 0.000000e+00 : f32
    %25 = vector.shape_cast %18 : vector<64x1xi1> to vector<64x1xi1>
    %26 = vector.broadcast %25 : vector<64x1xi1> to vector<64x4xi1>
    %27 = vector.broadcast %cst : f32 to vector<64x4xf32>
    %28 = arith.select %26, %27, %24 : vector<64x4xi1>, vector<64x4xf32>
    %c63_i32 = arith.constant 63 : i32
    %29 = tpu.dynamic_rotate %22 by %c63_i32 dim 0 : vector<64x4xf32>, i32 -> vector<64x4xf32>
    %cst_6 = arith.constant 0.000000e+00 : f32
    %30 = vector.shape_cast %20 : vector<64x1xi1> to vector<64x1xi1>
    %31 = vector.broadcast %30 : vector<64x1xi1> to vector<64x4xi1>
    %32 = vector.broadcast %cst_6 : f32 to vector<64x4xf32>
    %33 = arith.select %31, %32, %29 : vector<64x4xi1>, vector<64x4xf32>
    %34 = tpu.concatenate %28, %22, %33 in 1 : vector<64x4xf32>, vector<64x4xf32>, vector<64x4xf32> -> vector<64x12xf32>
    %c0_7 = arith.constant 0 : index
    %c0_8 = arith.constant 0 : index
    %35 = vector.load %arg2[%c0_7, %c0_8] : memref<12x16xf32, #tpu.memory_space<vmem>>, vector<12x16xf32>
    %cst_9 = arith.constant dense<0.000000e+00> : vector<64x16xf32>
    %36 = tpu.matmul %34, %35, %cst_9 {dimension_numbers = #tpu.dot_dimension_numbers<[1], [0], [0], [1], [0, 0, 1, 1], [], []>} : vector<64x12xf32>, vector<12x16xf32>, vector<64x16xf32> -> vector<64x16xf32>
    %c0_10 = arith.constant 0 : index
    %c0_11 = arith.constant 0 : index
    %37 = vector.load %arg3[%c0_10, %c0_11] : memref<1x16xf32, #tpu.memory_space<vmem>>, vector<1x16xf32>
    %38 = vector.broadcast %37 : vector<1x16xf32> to vector<64x16xf32>
    %39 = arith.addf %36, %38 : vector<64x16xf32>
    %cst_12 = arith.constant 0.000000e+00 : f32
    %40 = vector.broadcast %cst_12 : f32 to vector<64x16xf32>
    %41 = arith.maximumf %39, %40 : vector<64x16xf32>
    %c1_i32_13 = arith.constant 1 : i32
    %42 = tpu.dynamic_rotate %41 by %c1_i32_13 dim 0 : vector<64x16xf32>, i32 -> vector<64x16xf32>
    %cst_14 = arith.constant 0.000000e+00 : f32
    %43 = vector.shape_cast %18 : vector<64x1xi1> to vector<64x1xi1>
    %44 = vector.broadcast %43 : vector<64x1xi1> to vector<64x16xi1>
    %45 = vector.broadcast %cst_14 : f32 to vector<64x16xf32>
    %46 = arith.select %44, %45, %42 : vector<64x16xi1>, vector<64x16xf32>
    %c63_i32_15 = arith.constant 63 : i32
    %47 = tpu.dynamic_rotate %41 by %c63_i32_15 dim 0 : vector<64x16xf32>, i32 -> vector<64x16xf32>
    %cst_16 = arith.constant 0.000000e+00 : f32
    %48 = vector.shape_cast %20 : vector<64x1xi1> to vector<64x1xi1>
    %49 = vector.broadcast %48 : vector<64x1xi1> to vector<64x16xi1>
    %50 = vector.broadcast %cst_16 : f32 to vector<64x16xf32>
    %51 = arith.select %49, %50, %47 : vector<64x16xi1>, vector<64x16xf32>
    %52 = tpu.concatenate %46, %41, %51 in 1 : vector<64x16xf32>, vector<64x16xf32>, vector<64x16xf32> -> vector<64x48xf32>
    %c0_17 = arith.constant 0 : index
    %c0_18 = arith.constant 0 : index
    %53 = vector.load %arg4[%c0_17, %c0_18] : memref<48x16xf32, #tpu.memory_space<vmem>>, vector<48x16xf32>
    %cst_19 = arith.constant dense<0.000000e+00> : vector<64x16xf32>
    %54 = tpu.matmul %52, %53, %cst_19 {dimension_numbers = #tpu.dot_dimension_numbers<[1], [0], [0], [1], [0, 0, 1, 1], [], []>} : vector<64x48xf32>, vector<48x16xf32>, vector<64x16xf32> -> vector<64x16xf32>
    %c1_i32_20 = arith.constant 1 : i32
    %55 = tpu.dynamic_rotate %23 by %c1_i32_20 dim 0 : vector<64x24xf32>, i32 -> vector<64x24xf32>
    %cst_21 = arith.constant 0.000000e+00 : f32
    %56 = vector.shape_cast %18 : vector<64x1xi1> to vector<64x1xi1>
    %57 = vector.broadcast %56 : vector<64x1xi1> to vector<64x24xi1>
    %58 = vector.broadcast %cst_21 : f32 to vector<64x24xf32>
    %59 = arith.select %57, %58, %55 : vector<64x24xi1>, vector<64x24xf32>
    %c63_i32_22 = arith.constant 63 : i32
    %60 = tpu.dynamic_rotate %23 by %c63_i32_22 dim 0 : vector<64x24xf32>, i32 -> vector<64x24xf32>
    %cst_23 = arith.constant 0.000000e+00 : f32
    %61 = vector.shape_cast %20 : vector<64x1xi1> to vector<64x1xi1>
    %62 = vector.broadcast %61 : vector<64x1xi1> to vector<64x24xi1>
    %63 = vector.broadcast %cst_23 : f32 to vector<64x24xf32>
    %64 = arith.select %62, %63, %60 : vector<64x24xi1>, vector<64x24xf32>
    %65 = tpu.concatenate %59, %23, %64 in 1 : vector<64x24xf32>, vector<64x24xf32>, vector<64x24xf32> -> vector<64x72xf32>
    %c0_24 = arith.constant 0 : index
    %c0_25 = arith.constant 0 : index
    %66 = vector.load %arg5[%c0_24, %c0_25] : memref<72x16xf32, #tpu.memory_space<vmem>>, vector<72x16xf32>
    %cst_26 = arith.constant dense<0.000000e+00> : vector<64x16xf32>
    %67 = tpu.matmul %65, %66, %cst_26 {dimension_numbers = #tpu.dot_dimension_numbers<[1], [0], [0], [1], [0, 0, 1, 1], [], []>} : vector<64x72xf32>, vector<72x16xf32>, vector<64x16xf32> -> vector<64x16xf32>
    %68 = arith.addf %54, %67 : vector<64x16xf32>
    %c0_27 = arith.constant 0 : index
    %c0_28 = arith.constant 0 : index
    %69 = vector.load %arg6[%c0_27, %c0_28] : memref<1x16xf32, #tpu.memory_space<vmem>>, vector<1x16xf32>
    %70 = vector.broadcast %69 : vector<1x16xf32> to vector<64x16xf32>
    %71 = arith.addf %68, %70 : vector<64x16xf32>
    %cst_29 = arith.constant 0.000000e+00 : f32
    %72 = vector.broadcast %cst_29 : f32 to vector<64x16xf32>
    %73 = arith.maximumf %71, %72 : vector<64x16xf32>
    %c1_i32_30 = arith.constant 1 : i32
    %74 = tpu.dynamic_rotate %73 by %c1_i32_30 dim 0 : vector<64x16xf32>, i32 -> vector<64x16xf32>
    %cst_31 = arith.constant 0.000000e+00 : f32
    %75 = vector.shape_cast %18 : vector<64x1xi1> to vector<64x1xi1>
    %76 = vector.broadcast %75 : vector<64x1xi1> to vector<64x16xi1>
    %77 = vector.broadcast %cst_31 : f32 to vector<64x16xf32>
    %78 = arith.select %76, %77, %74 : vector<64x16xi1>, vector<64x16xf32>
    %c63_i32_32 = arith.constant 63 : i32
    %79 = tpu.dynamic_rotate %73 by %c63_i32_32 dim 0 : vector<64x16xf32>, i32 -> vector<64x16xf32>
    %cst_33 = arith.constant 0.000000e+00 : f32
    %80 = vector.shape_cast %20 : vector<64x1xi1> to vector<64x1xi1>
    %81 = vector.broadcast %80 : vector<64x1xi1> to vector<64x16xi1>
    %82 = vector.broadcast %cst_33 : f32 to vector<64x16xf32>
    %83 = arith.select %81, %82, %79 : vector<64x16xi1>, vector<64x16xf32>
    %84 = tpu.concatenate %78, %73, %83 in 1 : vector<64x16xf32>, vector<64x16xf32>, vector<64x16xf32> -> vector<64x48xf32>
    %c0_34 = arith.constant 0 : index
    %c0_35 = arith.constant 0 : index
    %85 = vector.load %arg7[%c0_34, %c0_35] : memref<48x32xf32, #tpu.memory_space<vmem>>, vector<48x32xf32>
    %cst_36 = arith.constant dense<0.000000e+00> : vector<64x32xf32>
    %86 = tpu.matmul %84, %85, %cst_36 {dimension_numbers = #tpu.dot_dimension_numbers<[1], [0], [0], [1], [0, 0, 1, 1], [], []>} : vector<64x48xf32>, vector<48x32xf32>, vector<64x32xf32> -> vector<64x32xf32>
    %c0_37 = arith.constant 0 : index
    %c0_38 = arith.constant 0 : index
    %87 = vector.load %arg8[%c0_37, %c0_38] : memref<1x32xf32, #tpu.memory_space<vmem>>, vector<1x32xf32>
    %88 = vector.broadcast %87 : vector<1x32xf32> to vector<64x32xf32>
    %89 = arith.addf %86, %88 : vector<64x32xf32>
    %cst_39 = arith.constant 0.000000e+00 : f32
    %90 = vector.broadcast %cst_39 : f32 to vector<64x32xf32>
    %91 = arith.maximumf %89, %90 : vector<64x32xf32>
    %c1_i32_40 = arith.constant 1 : i32
    %92 = tpu.dynamic_rotate %91 by %c1_i32_40 dim 0 : vector<64x32xf32>, i32 -> vector<64x32xf32>
    %cst_41 = arith.constant 0.000000e+00 : f32
    %93 = vector.shape_cast %18 : vector<64x1xi1> to vector<64x1xi1>
    %94 = vector.broadcast %93 : vector<64x1xi1> to vector<64x32xi1>
    %95 = vector.broadcast %cst_41 : f32 to vector<64x32xf32>
    %96 = arith.select %94, %95, %92 : vector<64x32xi1>, vector<64x32xf32>
    %c63_i32_42 = arith.constant 63 : i32
    %97 = tpu.dynamic_rotate %91 by %c63_i32_42 dim 0 : vector<64x32xf32>, i32 -> vector<64x32xf32>
    %cst_43 = arith.constant 0.000000e+00 : f32
    %98 = vector.shape_cast %20 : vector<64x1xi1> to vector<64x1xi1>
    %99 = vector.broadcast %98 : vector<64x1xi1> to vector<64x32xi1>
    %100 = vector.broadcast %cst_43 : f32 to vector<64x32xf32>
    %101 = arith.select %99, %100, %97 : vector<64x32xi1>, vector<64x32xf32>
    %102 = tpu.concatenate %96, %91, %101 in 1 : vector<64x32xf32>, vector<64x32xf32>, vector<64x32xf32> -> vector<64x96xf32>
    %c0_44 = arith.constant 0 : index
    %c0_45 = arith.constant 0 : index
    %103 = vector.load %arg9[%c0_44, %c0_45] : memref<96x64xf32, #tpu.memory_space<vmem>>, vector<96x64xf32>
    %cst_46 = arith.constant dense<0.000000e+00> : vector<64x64xf32>
    %104 = tpu.matmul %102, %103, %cst_46 {dimension_numbers = #tpu.dot_dimension_numbers<[1], [0], [0], [1], [0, 0, 1, 1], [], []>} : vector<64x96xf32>, vector<96x64xf32>, vector<64x64xf32> -> vector<64x64xf32>
    %c0_47 = arith.constant 0 : index
    %c0_48 = arith.constant 0 : index
    %105 = vector.load %arg10[%c0_47, %c0_48] : memref<1x64xf32, #tpu.memory_space<vmem>>, vector<1x64xf32>
    %106 = vector.broadcast %105 : vector<1x64xf32> to vector<64x64xf32>
    %107 = arith.addf %104, %106 : vector<64x64xf32>
    %cst_49 = arith.constant 0.000000e+00 : f32
    %108 = vector.broadcast %cst_49 : f32 to vector<64x64xf32>
    %109 = arith.maximumf %107, %108 : vector<64x64xf32>
    %c1_i32_50 = arith.constant 1 : i32
    %110 = tpu.dynamic_rotate %109 by %c1_i32_50 dim 0 : vector<64x64xf32>, i32 -> vector<64x64xf32>
    %cst_51 = arith.constant 0.000000e+00 : f32
    %111 = vector.shape_cast %18 : vector<64x1xi1> to vector<64x1xi1>
    %112 = vector.broadcast %111 : vector<64x1xi1> to vector<64x64xi1>
    %113 = vector.broadcast %cst_51 : f32 to vector<64x64xf32>
    %114 = arith.select %112, %113, %110 : vector<64x64xi1>, vector<64x64xf32>
    %c63_i32_52 = arith.constant 63 : i32
    %115 = tpu.dynamic_rotate %109 by %c63_i32_52 dim 0 : vector<64x64xf32>, i32 -> vector<64x64xf32>
    %cst_53 = arith.constant 0.000000e+00 : f32
    %116 = vector.shape_cast %20 : vector<64x1xi1> to vector<64x1xi1>
    %117 = vector.broadcast %116 : vector<64x1xi1> to vector<64x64xi1>
    %118 = vector.broadcast %cst_53 : f32 to vector<64x64xf32>
    %119 = arith.select %117, %118, %115 : vector<64x64xi1>, vector<64x64xf32>
    %120 = tpu.concatenate %114, %109, %119 in 1 : vector<64x64xf32>, vector<64x64xf32>, vector<64x64xf32> -> vector<64x192xf32>
    %c0_54 = arith.constant 0 : index
    %c0_55 = arith.constant 0 : index
    %121 = vector.load %arg11[%c0_54, %c0_55] : memref<192x128xf32, #tpu.memory_space<vmem>>, vector<192x128xf32>
    %cst_56 = arith.constant dense<0.000000e+00> : vector<64x128xf32>
    %122 = tpu.matmul %120, %121, %cst_56 {dimension_numbers = #tpu.dot_dimension_numbers<[1], [0], [0], [1], [0, 0, 1, 1], [], []>} : vector<64x192xf32>, vector<192x128xf32>, vector<64x128xf32> -> vector<64x128xf32>
    %c0_57 = arith.constant 0 : index
    %c0_58 = arith.constant 0 : index
    %123 = vector.load %arg12[%c0_57, %c0_58] : memref<1x128xf32, #tpu.memory_space<vmem>>, vector<1x128xf32>
    %124 = vector.broadcast %123 : vector<1x128xf32> to vector<64x128xf32>
    %125 = arith.addf %122, %124 : vector<64x128xf32>
    %cst_59 = arith.constant 0.000000e+00 : f32
    %126 = vector.broadcast %cst_59 : f32 to vector<64x128xf32>
    %127 = arith.maximumf %125, %126 : vector<64x128xf32>
    %c0_60 = arith.constant 0 : index
    %c0_61 = arith.constant 0 : index
    %128 = vector.load %arg13[%c0_60, %c0_61] : memref<128x16xf32, #tpu.memory_space<vmem>>, vector<128x16xf32>
    %cst_62 = arith.constant dense<0.000000e+00> : vector<64x16xf32>
    %129 = tpu.matmul %127, %128, %cst_62 {dimension_numbers = #tpu.dot_dimension_numbers<[1], [0], [0], [1], [0, 0, 1, 1], [], []>} : vector<64x128xf32>, vector<128x16xf32>, vector<64x16xf32> -> vector<64x16xf32>
    %c0_63 = arith.constant 0 : index
    %c0_64 = arith.constant 0 : index
    %130 = vector.load %arg14[%c0_63, %c0_64] : memref<1x16xf32, #tpu.memory_space<vmem>>, vector<1x16xf32>
    %131 = vector.broadcast %130 : vector<1x16xf32> to vector<64x16xf32>
    %132 = arith.addf %129, %131 : vector<64x16xf32>
    %cst_65 = arith.constant 0.000000e+00 : f32
    %133 = vector.broadcast %cst_65 : f32 to vector<64x16xf32>
    %134 = arith.maximumf %132, %133 : vector<64x16xf32>
    %c0_66 = arith.constant 0 : index
    %c0_67 = arith.constant 0 : index
    %135 = vector.load %arg15[%c0_66, %c0_67] : memref<16x2xf32, #tpu.memory_space<vmem>>, vector<16x2xf32>
    %cst_68 = arith.constant dense<0.000000e+00> : vector<64x2xf32>
    %136 = tpu.matmul %134, %135, %cst_68 {dimension_numbers = #tpu.dot_dimension_numbers<[1], [0], [0], [1], [0, 0, 1, 1], [], []>} : vector<64x16xf32>, vector<16x2xf32>, vector<64x2xf32> -> vector<64x2xf32>
    %c0_69 = arith.constant 0 : index
    %c0_70 = arith.constant 0 : index
    %137 = vector.load %arg16[%c0_69, %c0_70] : memref<1x2xf32, #tpu.memory_space<vmem>>, vector<1x2xf32>
    %138 = vector.broadcast %137 : vector<1x2xf32> to vector<64x2xf32>
    %139 = arith.addf %136, %138 : vector<64x2xf32>
    %c0_71 = arith.constant 0 : index
    %c0_72 = arith.constant 0 : index
    %140 = vector.load %arg17[%c0_71, %c0_72] : memref<64x2xf32, #tpu.memory_space<vmem>>, vector<64x2xf32>
    tpu.vector_store %arg17[%c0_71, %c0_72], %139 {strides = array<i32>} : memref<64x2xf32, #tpu.memory_space<vmem>>, vector<64x2xf32>,
    return
  }
  func.func @transform_0(%arg0: i32) -> (i32, i32) {
    %c0_i32 = arith.constant 0 : i32
    %c0_i32_0 = arith.constant 0 : i32
    return %arg0, %c0_i32 : i32, i32
  }
  func.func @transform_1(%arg0: i32) -> (i32, i32) {
    %c0_i32 = arith.constant 0 : i32
    %c0_i32_0 = arith.constant 0 : i32
    %c0_i32_1 = arith.constant 0 : i32
    return %c0_i32, %c0_i32_0 : i32, i32
  }
  func.func @transform_2(%arg0: i32) -> (i32, i32) {
    %c0_i32 = arith.constant 0 : i32
    %c0_i32_0 = arith.constant 0 : i32
    %c0_i32_1 = arith.constant 0 : i32
    return %c0_i32, %c0_i32_0 : i32, i32
  }
  func.func @transform_3(%arg0: i32) -> (i32, i32) {
    %c0_i32 = arith.constant 0 : i32
    %c0_i32_0 = arith.constant 0 : i32
    %c0_i32_1 = arith.constant 0 : i32
    return %c0_i32, %c0_i32_0 : i32, i32
  }
  func.func @transform_4(%arg0: i32) -> (i32, i32) {
    %c0_i32 = arith.constant 0 : i32
    %c0_i32_0 = arith.constant 0 : i32
    %c0_i32_1 = arith.constant 0 : i32
    return %c0_i32, %c0_i32_0 : i32, i32
  }
  func.func @transform_5(%arg0: i32) -> (i32, i32) {
    %c0_i32 = arith.constant 0 : i32
    %c0_i32_0 = arith.constant 0 : i32
    %c0_i32_1 = arith.constant 0 : i32
    return %c0_i32, %c0_i32_0 : i32, i32
  }
  func.func @transform_6(%arg0: i32) -> (i32, i32) {
    %c0_i32 = arith.constant 0 : i32
    %c0_i32_0 = arith.constant 0 : i32
    %c0_i32_1 = arith.constant 0 : i32
    return %c0_i32, %c0_i32_0 : i32, i32
  }
  func.func @transform_7(%arg0: i32) -> (i32, i32) {
    %c0_i32 = arith.constant 0 : i32
    %c0_i32_0 = arith.constant 0 : i32
    %c0_i32_1 = arith.constant 0 : i32
    return %c0_i32, %c0_i32_0 : i32, i32
  }
  func.func @transform_8(%arg0: i32) -> (i32, i32) {
    %c0_i32 = arith.constant 0 : i32
    %c0_i32_0 = arith.constant 0 : i32
    %c0_i32_1 = arith.constant 0 : i32
    return %c0_i32, %c0_i32_0 : i32, i32
  }
  func.func @transform_9(%arg0: i32) -> (i32, i32) {
    %c0_i32 = arith.constant 0 : i32
    %c0_i32_0 = arith.constant 0 : i32
    %c0_i32_1 = arith.constant 0 : i32
    return %c0_i32, %c0_i32_0 : i32, i32
  }
  func.func @transform_10(%arg0: i32) -> (i32, i32) {
    %c0_i32 = arith.constant 0 : i32
    %c0_i32_0 = arith.constant 0 : i32
    %c0_i32_1 = arith.constant 0 : i32
    return %c0_i32, %c0_i32_0 : i32, i32
  }
  func.func @transform_11(%arg0: i32) -> (i32, i32) {
    %c0_i32 = arith.constant 0 : i32
    %c0_i32_0 = arith.constant 0 : i32
    %c0_i32_1 = arith.constant 0 : i32
    return %c0_i32, %c0_i32_0 : i32, i32
  }
  func.func @transform_12(%arg0: i32) -> (i32, i32) {
    %c0_i32 = arith.constant 0 : i32
    %c0_i32_0 = arith.constant 0 : i32
    %c0_i32_1 = arith.constant 0 : i32
    return %c0_i32, %c0_i32_0 : i32, i32
  }
  func.func @transform_13(%arg0: i32) -> (i32, i32) {
    %c0_i32 = arith.constant 0 : i32
    %c0_i32_0 = arith.constant 0 : i32
    %c0_i32_1 = arith.constant 0 : i32
    return %c0_i32, %c0_i32_0 : i32, i32
  }
  func.func @transform_14(%arg0: i32) -> (i32, i32) {
    %c0_i32 = arith.constant 0 : i32
    %c0_i32_0 = arith.constant 0 : i32
    %c0_i32_1 = arith.constant 0 : i32
    return %c0_i32, %c0_i32_0 : i32, i32
  }
  func.func @transform_15(%arg0: i32) -> (i32, i32) {
    %c0_i32 = arith.constant 0 : i32
    %c0_i32_0 = arith.constant 0 : i32
    %c0_i32_1 = arith.constant 0 : i32
    return %c0_i32, %c0_i32_0 : i32, i32
  }
  func.func @transform_16(%arg0: i32) -> (i32, i32) {
    %c0_i32 = arith.constant 0 : i32
    %c0_i32_0 = arith.constant 0 : i32
    return %arg0, %c0_i32 : i32, i32
  }
}

</mosaic_0001>

<bundles_post_ra>
// kernel: squeeze.2
= control target key start
LH: loop header
LB: loop body
LE: loop exit
PB: predicated region body
PF: predicated region fallthrough
CT: control target
= control target key end

     0   :  { %s77_s0 = inlined_call_operand.vmem [shape: f32[64], index: 0, kind: input, shape index: {}]   ;;  %s78_s1 = inlined_call_operand.hbm [shape: f32[2,32], index: 1, kind: output, shape index: {}]  }
   0x1   :  { %v6_v0 = vld [vmem:[%s77_s0] sm:$0x1] }
   0x2   :  { %2 = vsyncpa [#allocation1], 0  ;;  %7 = vst [vmem:[#allocation3] sm:$0x1] %v6_v0  ;;  %vm9_vm0 = vcmask 261120   ;;  %s59_s0 = smov 96  }
   0x3   :  { %s60_s8 = smov [#allocation0]  }
   0x4   :  { %s29_s9 = sshll.u32 %s60_s8, 4  ;;  %s30_s9 = int_to_ptr.vmem [resolvable:$true] %s29_s9 }
   0x5   :  { %s37_s10 = scalar_lea.vmem %s30_s9, 32  ;;  %p42_p1 = scmp.lt.s32.totalorder %s30_s9, %s30_s9 }
   0x6   :  { %p38_p0 = scmp.ne.s32.totalorder %s30_s9, %s37_s10  ;;  %p43_p2 = scmp.lt.s32.totalorder %s37_s10, %s37_s10 }
   0x8   :  { %p44_p3 = por %p43_p2, %p42_p1 }
   0x9   :  { %v11_v1 = vld [vmem:[#allocation3] sm:$0x1]  }
   0xa   :  { %v8_v2 = vld [vmem:[#allocation3] sm:$0x1]   ;;  %12 = vrot.lane.b32.xlu0 %v11_v1, %s59_s0  ;;  %p45_p4 = pnand %p44_p3, %p38_p0 }
   0xb   :  { %10 = vst.msk [vmem:[#allocation2] sm:$0x1] %vm9_vm0, %v8_v2  }
  0x7c   :  { %v13_v3 = vpop.permute.xlu0 %12  }
  0x7d   :  { %16 = vst.msk [vmem:[#allocation2 + $0x1] sm:$0x1] %vm9_vm0, %v13_v3  }
  0x84   :  { %v21_v4 = vld [vmem:[#allocation2] sm:$0x3] }
  0x85   :  { %24 = vst [vmem:[#allocation0] sm:$0x3] %v21_v4 }
  0x86   :  { %48 = shalt.err (!%p45_p4)
}
  0x87   :  { %32 = dma.vmem_to_hbm [thread:$0]  %s30_s9, 32, %s78_s1, [#allocation1]  }
  0x88   :  { %57 = dma.done.wait [#allocation1], 32  }
  0x89   :  { %58 = vsyncadd [#allocation1], 4294967264 }
  0x8a   :  { %34 = vsyncpa [#allocation1], 1 }

// kernel: char_cnn_forward.1
= control target key start
LH: loop header
LB: loop body
LE: loop exit
PB: predicated region body
PF: predicated region fallthrough
CT: control target
= control target key end

     0   :  { %v53_v0 = vlaneseq  ;;  %s2549_s28 = smov 4   ;;  %vm380_vm0 = vcmask 1043456   ;;  %s2550_s22 = smov 8   ;;  %vm328_vm6 = vcmask 31744   ;;  %vm337_vm7 = vcmask 64512   ;;  %s3703_s0 = inlined_call_operand.vmem [shape: f32[64,28], index: 0, kind: input, shape index: {}]   ;;  %s3704_s1 = inlined_call_operand.vmem [shape: f32[12,16], index: 1, kind: input, shape index: {}]   ;;  %s3705_s4 = inlined_call_operand.vmem [shape: f32[72,16], index: 4, kind: input, shape index: {}]   ;;  %s3706_s2 = inlined_call_operand.vmem [shape: f32[1,16], index: 2, kind: input, shape index: {}]   ;;  %s3707_s3 = inlined_call_operand.vmem [shape: f32[48,16], index: 3, kind: input, shape index: {}]   ;;  %s3708_s5 = inlined_call_operand.vmem [shape: f32[1,16], index: 5, kind: input, shape index: {}]   ;;  %s3709_s6 = inlined_call_operand.vmem [shape: f32[48,32], index: 6, kind: input, shape index: {}]   ;;  %s3710_s8 = inlined_call_operand.vmem [shape: f32[96,64], index: 8, kind: input, shape index: {}]   ;;  %s3711_s7 = inlined_call_operand.vmem [shape: f32[1,32], index: 7, kind: input, shape index: {}]   ;;  %s3712_s10 = inlined_call_operand.vmem [shape: f32[192,128], index: 10, kind: input, shape index: {}]   ;;  %s3713_s9 = inlined_call_operand.vmem [shape: f32[1,64], index: 9, kind: input, shape index: {}]   ;;  %s3714_s12 = inlined_call_operand.vmem [shape: f32[128,16], index: 12, kind: input, shape index: {}]   ;;  %s3715_s11 = inlined_call_operand.vmem [shape: f32[1,128], index: 11, kind: input, shape index: {}]   ;;  %s3716_s14 = inlined_call_operand.vmem [shape: f32[16,2], index: 14, kind: input, shape index: {}]   ;;  %s3717_s13 = inlined_call_operand.vmem [shape: f32[1,16], index: 13, kind: input, shape index: {}]   ;;  %s3718_s15 = inlined_call_operand.vmem [shape: f32[1,2], index: 15, kind: input, shape index: {}]   ;;  %s3719_s16 = inlined_call_operand.vmem [shape: f32[64,2], index: 16, kind: output, shape index: {}]  }
   0x1   :  { %3721 = sst [smem:[#allocation2_spill]] %s3703_s0  ;;  %v347_v10 = vld [vmem:[%s3704_s1 + $0x8] sm:$0xf]  ;;  %v346_v13 = vld [vmem:[%s3704_s1] sm:$0xff]  ;;  %vm355_vm8 = vcmask 97280   ;;  %s2553_s25 = smov 48  }
   0x2   :  { %s3722_s23 = sld [smem:[#allocation2_spill]]  ;;  %v2660_v4 = vshrl.u32 %v53_v0, 7  ;;  %2350 = vmatprep.subr.msk.mxu0 %vm380_vm0, %v347_v10  ;;  %v787_v49 = vld [vmem:[%s3705_s4 + $0x40] sm:$0xff]  ;;  %vm761_vm10 = vcmask 195584   ;;  %vm770_vm11 = vcmask 392192   ;;  %vm788_vm12 = vcmask 588800  }
   0x3   :  { %2351 = vmatpush3.msk.msra.mxu0 %vm380_vm0, %v347_v10  ;;  %2366 = vmatprep.subr.mxu1 %v787_v49  ;;  %s2555_s18 = smov 32   ;;  %vm618_vm13 = vcmask 261120   ;;  %vm609_vm14 = vcmask 130048   ;;  %vm1468_vm15 = vcmask 523264   ;;  %vm1496_vm0 = vcmask 785408   ;;  %v1891_v46 = vld [vmem:[%s3714_s12 + $0x8] sm:$0xff] }
   0x4   :  { %vm231_vm1 = vcmp.lt.s32.totalorder %v2660_v4, 7  ;;  %v57_v9 = vadd.s32 24, %v2660_v4  ;;  %2352 = vmatprep.subr.mxu0 %v346_v13  ;;  %vm190_vm2 = vcmp.lt.s32.totalorder %v2660_v4, 1  ;;  %v61_v41 = vadd.s32 56, %v2660_v4  ;;  %2367 = vmatpush3.msra.mxu1 %v787_v49 }
   0x5   :  { %2353 = vmatpush3.msra.mxu0 %v346_v13  ;;  %v66_v50 = vand.u32 31, %v2660_v4  ;;  %v58_v59 = vadd.s32 32, %v2660_v4  ;;  %v1896_v4 = vld [vmem:[%s3714_s12 + $0x30] sm:$0xff] }
   0x6   :  { %v87_v16 = vand.u32 31, %v57_v9  ;;  %v115_v44 = vand.u32 31, %v61_v41 }
   0x7   :  { %vm2814_vm5 = vcmp.eq.s32.totalorder %v66_v50, 0  ;;  %v94_v0 = vand.u32 31, %v58_v59 }
   0x8   :  { %v2646_v1 = vld [vmem:[%s3722_s23] sm:$0xff]  ;;  %v2651_v2 = vld [vmem:[%s3722_s23 + $0x8] sm:$0xff]  ;;  %v2656_v3 = vld [vmem:[%s3722_s23 + $0x10] sm:$0xff]  ;;  %vm2714_vm3 = vcmp.eq.s32.totalorder %v87_v16, 31  ;;  %vm2775_vm4 = vcmp.eq.s32.totalorder %v115_v44, 31 }
   0x9   :  { %272 = vrot.lane.b32.xlu0 %v2646_v1, %s2549_s28  ;;  %v223_v5 = vrot.slane %v2646_v1, 1  ;;  %v224_v6 = vrot.slane %v2651_v2, 1  ;;  %v225_v7 = vrot.slane %v2656_v3, 1  ;;  %v2669_v8 = vld [vmem:[%s3722_s23 + $0x18] sm:$0xff]  ;;  %v2682_v12 = vld [vmem:[%s3722_s23 + $0x20] sm:$0xff]  ;;  %v182_v18 = vrot.slane %v2646_v1, 7 }
   0xa   :  { %v226_v15 = vrot.slane %v2669_v8, 1  ;;  %v227_v17 = vrot.slane %v2682_v12, 1  ;;  %v183_v19 = vrot.slane %v2651_v2, 7  ;;  %v179_v20 = vld [vmem:[%s3722_s23 + $0x28] sm:$0xff]  ;;  %v184_v22 = vrot.slane %v2656_v3, 7  ;;  %v2731_v31 = vld [vmem:[%s3722_s23 + $0x30] sm:$0xff] }
   0xb   :  { %v238_v11 = vsel %vm231_vm1, %v223_v5, %v224_v6  ;;  %v237_v14 = vsel %vm231_vm1, %v224_v6, %v225_v7  ;;  %v185_v23 = vrot.slane %v2669_v8, 7  ;;  %v186_v25 = vrot.slane %v2682_v12, 7  ;;  %v2762_v40 = vld [vmem:[%s3722_s23 + $0x38] sm:$0xff]  ;;  %s2551_s23 = smov 124  }
   0xc   :  { %304 = vrot.lane.b32.xlu1 %v238_v11, %s2550_s22  ;;  %v2707_v21 = vsel %vm190_vm2, %v182_v18, %v183_v19  ;;  %v236_v24 = vsel %vm231_vm1, %v225_v7, %v226_v15  ;;  %v187_v26 = vrot.slane %v179_v20, 7  ;;  %v235_v28 = vsel %vm231_vm1, %v226_v15, %v227_v17 }
   0xd   :  { %274 = vrot.lane.b32.xlu0 %v2651_v2, %s2549_s28  ;;  %v2722_v29 = vsel %vm190_vm2, %v183_v19, %v184_v22  ;;  %v2726_v30 = vsel %vm190_vm2, %v184_v22, %v185_v23  ;;  %v2735_v32 = vsel %vm190_vm2, %v185_v23, %v186_v25  ;;  %v188_v34 = vrot.slane %v2731_v31, 7  ;;  %v786_v22 = vld [vmem:[%s3705_s4 + $0x38] sm:$0xff]  ;;  %v785_v23 = vld [vmem:[%s3705_s4 + $0x30] sm:$0xff] }
   0xe   :  { %v2739_v33 = vsel %vm190_vm2, %v186_v25, %v187_v26  ;;  %v259_v35 = vsel %vm2714_vm3, 0.0, %v235_v28  ;;  %v228_v36 = vrot.slane %v179_v20, 1  ;;  %v229_v39 = vrot.slane %v2731_v31, 1  ;;  %2368 = vmatprep.subr.mxu1 %v786_v22 }
   0xf   :  { %v2751_v37 = vsel %vm190_vm2, %v187_v26, %v188_v34  ;;  %v230_v43 = vrot.slane %v2762_v40, 1  ;;  %v189_v51 = vrot.slane %v2762_v40, 7  ;;  %vm2834_vm9 = vcmp.eq.s32.totalorder %v94_v0, 0  ;;  %2369 = vmatpush3.msra.mxu1 %v786_v22 }
  0x10   :  { %306 = vrot.lane.b32.xlu1 %v237_v14, %s2550_s22  ;;  %v234_v38 = vsel %vm231_vm1, %v227_v17, %v228_v36  ;;  %v233_v42 = vsel %vm231_vm1, %v228_v36, %v229_v39  ;;  %2370 = vmatprep.subr.mxu1 %v785_v23 }
  0x11   :  { %276 = vrot.lane.b32.xlu0 %v2656_v3, %s2549_s28  ;;  %v232_v45 = vsel %vm231_vm1, %v229_v39, %v230_v43  ;;  %v239_v47 = vsel %vm231_vm1, %v230_v43, %v223_v5  ;;  %v198_v53 = vsel %vm190_vm2, %v189_v51, %v182_v18  ;;  %2371 = vmatpush3.msra.mxu1 %v785_v23 }
  0x12   :  { %v263_v48 = vsel %vm2775_vm4, 0.0, %v239_v47  ;;  %v215_v54 = vsel %vm2814_vm5, 0.0, %v198_v53 }
  0x14   :  { %278 = vrot.lane.b32.xlu1 %v2669_v8, %s2549_s28 }
  0x15   :  { %308 = vrot.lane.b32.xlu0 %v236_v24, %s2550_s22  ;;  %v191_v24 = vsel %vm190_vm2, %v188_v34, %v189_v51 }
  0x18   :  { %310 = vrot.lane.b32.xlu1 %v259_v35, %s2550_s22 }
  0x19   :  { %280 = vrot.lane.b32.xlu0 %v2682_v12, %s2549_s28 }
  0x1c   :  { %282 = vrot.lane.b32.xlu1 %v179_v20, %s2549_s28 }
  0x1d   :  { %312 = vrot.lane.b32.xlu0 %v234_v38, %s2550_s22 }
  0x20   :  { %314 = vrot.lane.b32.xlu1 %v233_v42, %s2550_s22 }
  0x21   :  { %284 = vrot.lane.b32.xlu0 %v2731_v31, %s2549_s28 }
  0x24   :  { %286 = vrot.lane.b32.xlu1 %v2762_v40, %s2549_s28  ;;  %s2552_s28 = smov 20  }
  0x25   :  { %316 = vrot.lane.b32.xlu0 %v232_v45, %s2550_s22 }
  0x28   :  { %318 = vrot.lane.b32.xlu1 %v263_v48, %s2550_s22 }
  0x29   :  { %633 = vrot.lane.b32.xlu0 %v2646_v1, %s2551_s23 }
  0x2c   :  { %635 = vrot.lane.b32.xlu1 %v2651_v2, %s2551_s23 }
  0x2d   :  { %637 = vrot.lane.b32.xlu0 %v2656_v3, %s2551_s23 }
  0x30   :  { %639 = vrot.lane.b32.xlu1 %v2669_v8, %s2551_s23 }
  0x31   :  { %641 = vrot.lane.b32.xlu0 %v2682_v12, %s2551_s23 }
  0x34   :  { %643 = vrot.lane.b32.xlu1 %v179_v20, %s2551_s23 }
  0x35   :  { %645 = vrot.lane.b32.xlu0 %v2731_v31, %s2551_s23 }
  0x38   :  { %647 = vrot.lane.b32.xlu1 %v2762_v40, %s2551_s23 }
  0x39   :  { %707 = vrot.lane.b32.xlu0 %v2651_v2, %s2552_s28 }
  0x3c   :  { %705 = vrot.lane.b32.xlu1 %v2646_v1, %s2552_s28 }
  0x3d   :  { %711 = vrot.lane.b32.xlu0 %v2669_v8, %s2552_s28  ;;  %v219_v8 = vsel %vm2834_vm9, 0.0, %v2735_v32 }
  0x40   :  { %709 = vrot.lane.b32.xlu1 %v2656_v3, %s2552_s28 }
  0x41   :  { %715 = vrot.lane.b32.xlu0 %v179_v20, %s2552_s28 }
  0x44   :  { %713 = vrot.lane.b32.xlu1 %v2682_v12, %s2552_s28 }
  0x48   :  { %717 = vrot.lane.b32.xlu1 %v2731_v31, %s2552_s28  ;;  %v783_v31 = vld [vmem:[%s3705_s4 + $0x20] sm:$0xff] }
  0x7b   :  { %v273_v55 = vpop.permute.xlu0 %272 }
  0x7c   :  { %v329_v56 = vsel %vm328_vm6, %v215_v54, %v273_v55 }
  0x7e   :  { %v305_v58 = vpop.permute.xlu1 %304 }
  0x7f   :  { %v275_v57 = vpop.permute.xlu0 %274  ;;  %v338_v60 = vsel %vm337_vm7, %v329_v56, %v305_v58 }
  0x80   :  { %v330_v61 = vsel %vm328_vm6, %v2707_v21, %v275_v57  ;;  %2354 = vmatprep.mubr.msk.f32.mxu0 %vm355_vm8, %v338_v60 }
  0x82   :  { %v307_v63 = vpop.permute.xlu1 %306 }
  0x83   :  { %v277_v62 = vpop.permute.xlu0 %276  ;;  %v339_v1 = vsel %vm337_vm7, %v330_v61, %v307_v63 }
  0x84   :  { %v331_v2 = vsel %vm328_vm6, %v2722_v29, %v277_v62  ;;  %2355 = vmatmul.mubr.msk.f32.vlgmr.msra.gmra.mxu0 %vm355_vm8, %v339_v1 }
  0x86   :  { %v279_v5 = vpop.permute.xlu1 %278 }
  0x87   :  { %v309_v3 = vpop.permute.xlu0 %308  ;;  %v332_v9 = vsel %vm328_vm6, %v2726_v30, %v279_v5  ;;  %v784_v30 = vld [vmem:[%s3705_s4 + $0x28] sm:$0xff]  ;;  %v781_v5 = vld [vmem:[%s3705_s4 + $0x10] sm:$0xff] }
  0x88   :  { %v340_v7 = vsel %vm337_vm7, %v331_v2, %v309_v3  ;;  %2372 = vmatprep.subr.mxu1 %v784_v30  ;;  %v782_v3 = vld [vmem:[%s3705_s4 + $0x18] sm:$0xff] }
  0x89   :  { %2357 = vmatprep.mubr.msk.f32.mxu0 %vm355_vm8, %v340_v7  ;;  %2373 = vmatpush3.msra.mxu1 %v784_v30 }
  0x8a   :  { %v311_v11 = vpop.permute.xlu1 %310  ;;  %2374 = vmatprep.subr.mxu1 %v783_v31 }
  0x8b   :  { %v281_v10 = vpop.permute.xlu0 %280  ;;  %v341_v12 = vsel %vm337_vm7, %v332_v9, %v311_v11  ;;  %2375 = vmatpush3.msra.mxu1 %v783_v31 }
  0x8c   :  { %v333_v13 = vsel %vm328_vm6, %v219_v8, %v281_v10  ;;  %2358 = vmatmul.mubr.msk.f32.gmra.mxu0 %vm355_vm8, %v341_v12  ;;  %2376 = vmatprep.subr.mxu1 %v782_v3  ;;  %v780_v10 = vld [vmem:[%s3705_s4 + $0x8] sm:$0xff]  ;;  %v779_v12 = vld [vmem:[%s3705_s4] sm:$0xff] }
  0x8d   :  { %2377 = vmatpush3.msra.mxu1 %v782_v3 }
  0x8e   :  { %v283_v15 = vpop.permute.xlu1 %282  ;;  %2378 = vmatprep.subr.mxu1 %v781_v5 }
  0x8f   :  { %v313_v14 = vpop.permute.xlu0 %312  ;;  %v334_v17 = vsel %vm328_vm6, %v2739_v33, %v283_v15  ;;  %2379 = vmatpush3.msra.mxu1 %v781_v5  ;;  %v628_v5 = vld [vmem:[%s3707_s3 + $0x8] sm:$0xff] }
  0x90   :  { %v342_v16 = vsel %vm337_vm7, %v333_v13, %v313_v14  ;;  %2380 = vmatprep.subr.mxu1 %v780_v10 }
  0x91   :  { %2360 = vmatprep.mubr.msk.f32.mxu0 %vm355_vm8, %v342_v16  ;;  %2381 = vmatpush3.msra.mxu1 %v780_v10  ;;  %v627_v10 = vld [vmem:[%s3707_s3] sm:$0xff] }
  0x92   :  { %v315_v18 = vpop.permute.xlu1 %314  ;;  %2382 = vmatprep.subr.mxu1 %v779_v12 }
  0x93   :  { %v285_v19 = vpop.permute.xlu0 %284  ;;  %v343_v20 = vsel %vm337_vm7, %v334_v17, %v315_v18  ;;  %2383 = vmatpush3.msra.mxu1 %v779_v12 }
  0x94   :  { %2361 = vmatmul.mubr.msk.f32.gmra.mxu0 %vm355_vm8, %v343_v20  ;;  %v335_v21 = vsel %vm328_vm6, %v2751_v37, %v285_v19 }
  0x96   :  { %v287_v25 = vpop.permute.xlu1 %286 }
  0x97   :  { %v317_v26 = vpop.permute.xlu0 %316  ;;  %v336_v29 = vsel %vm328_vm6, %v191_v24, %v287_v25 }
  0x98   :  { %v344_v28 = vsel %vm337_vm7, %v335_v21, %v317_v26 }
  0x99   :  { %2363 = vmatprep.mubr.msk.f32.mxu0 %vm355_vm8, %v344_v28 }
  0x9a   :  { %v319_v32 = vpop.permute.xlu1 %318 }
  0x9b   :  { %v2875_v33 = vpop.permute.xlu0 %633  ;;  %v345_v34 = vsel %vm337_vm7, %v336_v29, %v319_v32 }
  0x9c   :  { %2364 = vmatmul.mubr.msk.f32.gmra.mxu0 %vm355_vm8, %v345_v34  ;;  %v681_v35 = vrot.slane %v2875_v33, 1  ;;  %v657_v8 = vrot.slane %v2875_v33, 7 }
  0x9e   :  { %v636_v36 = vpop.permute.xlu1 %635 }
  0x9f   :  { %v638_v37 = vpop.permute.xlu0 %637  ;;  %v658_v38 = vrot.slane %v636_v36, 7  ;;  %v682_v39 = vrot.slane %v636_v36, 1 }
  0xa0   :  { %v659_v41 = vrot.slane %v638_v37, 7  ;;  %v683_v42 = vrot.slane %v638_v37, 1 }
  0xa1   :  { %v695_v43 = vsel %vm231_vm1, %v681_v35, %v682_v39  ;;  %v671_v11 = vsel %vm190_vm2, %v657_v8, %v658_v38 }
  0xa2   :  { %v2884_v44 = vsel %vm190_vm2, %v658_v38, %v659_v41  ;;  %737 = vrot.lane.b32.xlu1 %v695_v43, %s2553_s25  ;;  %v640_v45 = vpop.permute.xlu1 %639  ;;  %v694_v48 = vsel %vm231_vm1, %v682_v39, %v683_v42 }
  0xa3   :  { %v642_v47 = vpop.permute.xlu0 %641  ;;  %v660_v49 = vrot.slane %v640_v45, 7  ;;  %v684_v50 = vrot.slane %v640_v45, 1 }
  0xa4   :  { %v661_v51 = vrot.slane %v642_v47, 7  ;;  %v685_v54 = vrot.slane %v642_v47, 1 }
  0xa5   :  { %v693_v57 = vsel %vm231_vm1, %v683_v42, %v684_v50  ;;  %v669_v14 = vsel %vm190_vm2, %v659_v41, %v660_v49 }
  0xa6   :  { %v2891_v53 = vsel %vm190_vm2, %v660_v49, %v661_v51  ;;  %739 = vrot.lane.b32.xlu1 %v694_v48, %s2553_s25  ;;  %v644_v55 = vpop.permute.xlu1 %643  ;;  %v692_v1 = vsel %vm231_vm1, %v684_v50, %v685_v54  ;;  %v2974_v50 = vld [vmem:[%s3706_s2] ss:$0 sm:$0xff]  ;;  %s2554_s2 = smov 16  }
  0xa7   :  { %v646_v56 = vpop.permute.xlu0 %645  ;;  %v662_v58 = vrot.slane %v644_v55, 7  ;;  %v686_v59 = vrot.slane %v644_v55, 1  ;;  %v700_v2 = vsel %vm2714_vm3, 0.0, %v692_v1  ;;  %v677_v38 = vsel %vm2834_vm9, 0.0, %v2891_v53  ;;  %v632_v53 = vld [vmem:[%s3707_s3 + $0x28] sm:$0xff] }
  0xa8   :  { %v663_v60 = vrot.slane %v646_v56, 7  ;;  %v687_v62 = vrot.slane %v646_v56, 1  ;;  %2396 = vmatprep.subr.mxu0 %v632_v53 }
  0xa9   :  { %v691_v63 = vsel %vm231_vm1, %v685_v54, %v686_v59  ;;  %v667_v15 = vsel %vm190_vm2, %v661_v51, %v662_v58  ;;  %v631_v54 = vld [vmem:[%s3707_s3 + $0x20] sm:$0xff]  ;;  %2397 = vmatpush3.msra.mxu0 %v632_v53 }
  0xaa   :  { %v2898_v61 = vsel %vm190_vm2, %v662_v58, %v663_v60  ;;  %741 = vrot.lane.b32.xlu1 %v693_v57, %s2553_s25  ;;  %v690_v0 = vsel %vm231_vm1, %v686_v59, %v687_v62  ;;  %v648_v7 = vpop.permute.xlu1 %647  ;;  %2398 = vmatprep.subr.mxu0 %v631_v54 }
  0xab   :  { %v688_v9 = vrot.slane %v648_v7, 1  ;;  %v664_v16 = vrot.slane %v648_v7, 7  ;;  %v708_v26 = vpop.permute.xlu0 %707  ;;  %2399 = vmatpush3.msra.mxu0 %v631_v54 }
  0xac   :  { %v763_v30 = vsel %vm761_vm10, %v671_v11, %v708_v26 }
  0xad   :  { %v2929_v13 = vsel %vm231_vm1, %v688_v9, %v681_v35  ;;  %v2937_v17 = vsel %vm231_vm1, %v687_v62, %v688_v9  ;;  %v2941_v18 = vsel %vm190_vm2, %v663_v60, %v664_v16  ;;  %v672_v22 = vsel %vm190_vm2, %v664_v16, %v657_v8  ;;  %v630_v60 = vld [vmem:[%s3707_s3 + $0x18] sm:$0xff]  ;;  %v629_v62 = vld [vmem:[%s3707_s3 + $0x10] sm:$0xff] }
  0xae   :  { %745 = vrot.lane.b32.xlu1 %v691_v63, %s2553_s25  ;;  %v706_v19 = vpop.permute.xlu1 %705  ;;  %v673_v24 = vsel %vm2814_vm5, 0.0, %v672_v22  ;;  %2400 = vmatprep.subr.mxu0 %v630_v60 }
  0xaf   :  { %v762_v25 = vsel %vm761_vm10, %v673_v24, %v706_v19  ;;  %v712_v37 = vpop.permute.xlu0 %711  ;;  %2401 = vmatpush3.msra.mxu0 %v630_v60  ;;  %v704_v60 = vsel %vm2775_vm4, 0.0, %v2929_v13 }
  0xb0   :  { %v765_v43 = vsel %vm761_vm10, %v669_v14, %v712_v37  ;;  %2402 = vmatprep.subr.mxu0 %v629_v62 }
  0xb1   :  { %2403 = vmatpush3.msra.mxu0 %v629_v62 }
  0xb2   :  { %747 = vrot.lane.b32.xlu1 %v690_v0, %s2553_s25  ;;  %v710_v20 = vpop.permute.xlu1 %709  ;;  %2404 = vmatprep.subr.mxu0 %v628_v5 }
  0xb3   :  { %v764_v33 = vsel %vm761_vm10, %v2884_v44, %v710_v20  ;;  %v716_v42 = vpop.permute.xlu0 %715  ;;  %2405 = vmatpush3.msra.mxu0 %v628_v5 }
  0xb4   :  { %v767_v47 = vsel %vm761_vm10, %v667_v15, %v716_v42  ;;  %2406 = vmatprep.subr.mxu0 %v627_v10 }
  0xb5   :  { %2407 = vmatpush3.msra.mxu0 %v627_v10 }
  0xb6   :  { %743 = vrot.lane.b32.xlu1 %v700_v2, %s2553_s25  ;;  %v714_v21 = vpop.permute.xlu1 %713 }
  0xb7   :  { %v766_v41 = vsel %vm761_vm10, %v677_v38, %v714_v21 }
  0xba   :  { %v2945_v23 = vpop.permute.xlu1 %717 }
 0x114   :  { %v738_v28 = vpop.permute.xlu1 %737 }
 0x115   :  { %v771_v29 = vsel %vm770_vm11, %v762_v25, %v738_v28 }
 0x116   :  { %2384 = vmatprep.mubr.msk.f32.mxu1 %vm788_vm12, %v771_v29 }
 0x118   :  { %v740_v31 = vpop.permute.xlu1 %739 }
 0x119   :  { %v772_v32 = vsel %vm770_vm11, %v763_v30, %v740_v31 }
 0x11a   :  { %2385 = vmatmul.mubr.msk.f32.vlgmr.msra.gmra.mxu1 %vm788_vm12, %v772_v32 }
 0x11c   :  { %v742_v34 = vpop.permute.xlu1 %741 }
 0x11d   :  { %v773_v35 = vsel %vm770_vm11, %v764_v33, %v742_v34 }
 0x11e   :  { %2387 = vmatprep.mubr.msk.f32.mxu1 %vm788_vm12, %v773_v35 }
 0x120   :  { %v746_v36 = vpop.permute.xlu1 %745 }
 0x121   :  { %v775_v44 = vsel %vm770_vm11, %v766_v41, %v746_v36 }
 0x124   :  { %v748_v39 = vpop.permute.xlu1 %747 }
 0x125   :  { %v776_v49 = vsel %vm770_vm11, %v767_v47, %v748_v39 }
 0x128   :  { %v744_v45 = vpop.permute.xlu1 %743 }
 0x129   :  { %v774_v48 = vsel %vm770_vm11, %v765_v43, %v744_v45 }
 0x12a   :  { %2388 = vmatmul.mubr.msk.f32.gmra.mxu1 %vm788_vm12, %v774_v48 }
 0x12b   :  { %2390 = vmatprep.mubr.msk.f32.mxu1 %vm788_vm12, %v775_v44 }
 0x12e   :  { %2391 = vmatmul.mubr.msk.f32.gmra.mxu1 %vm788_vm12, %v776_v49 }
 0x144   :  { %v2356_v51 = vpop.f32.mrf.mxu0 }
 0x145   :  { %v456_v55 = vadd.f32 %v2356_v51, %v2974_v50 }
 0x146   :  { %v450_v56 = vpop.f32.mrf.mxu0 }
 0x147   :  { %v490_v57 = vmax.f32 %v456_v55, 0.0  ;;  %v451_v58 = vadd.f32 %v2974_v50, %v450_v56 }
 0x149   :  { %v2984_v59 = vmax.f32 %v451_v58, 0.0  ;;  %555 = vrot.lane.b32.xlu0 %v490_v57, %s2554_s2  ;;  %v498_v63 = vrot.slane %v490_v57, 7  ;;  %v522_v0 = vrot.slane %v490_v57, 1 }
 0x14b   :  { %v497_v1 = vrot.slane %v2984_v59, 7  ;;  %v521_v2 = vrot.slane %v2984_v59, 1 }
 0x14c   :  { %v2359_v3 = vpop.f32.mrf.mxu0 }
 0x14d   :  { %v466_v7 = vadd.f32 %v2359_v3, %v2974_v50  ;;  %553 = vrot.lane.b32.xlu0 %v2984_v59, %s2554_s2  ;;  %v535_v8 = vsel %vm231_vm1, %v521_v2, %v522_v0  ;;  %v3007_v9 = vsel %vm190_vm2, %v497_v1, %v498_v63 }
 0x14e   :  { %v460_v11 = vpop.f32.mrf.mxu0  ;;  %585 = vrot.lane.b32.xlu1 %v535_v8, %s2555_s18 }
 0x14f   :  { %v492_v12 = vmax.f32 %v466_v7, 0.0  ;;  %v461_v14 = vadd.f32 %v2974_v50, %v460_v11 }
 0x151   :  { %v491_v15 = vmax.f32 %v461_v14, 0.0  ;;  %559 = vrot.lane.b32.xlu0 %v492_v12, %s2554_s2  ;;  %v500_v16 = vrot.slane %v492_v12, 7  ;;  %v524_v19 = vrot.slane %v492_v12, 1 }
 0x153   :  { %v499_v20 = vrot.slane %v491_v15, 7  ;;  %v523_v21 = vrot.slane %v491_v15, 1 }
 0x154   :  { %v2362_v22 = vpop.f32.mrf.mxu0 }
 0x155   :  { %v476_v24 = vadd.f32 %v2362_v22, %v2974_v50  ;;  %557 = vrot.lane.b32.xlu0 %v491_v15, %s2554_s2  ;;  %v533_v25 = vsel %vm231_vm1, %v523_v21, %v524_v19  ;;  %v3021_v26 = vsel %vm190_vm2, %v499_v20, %v500_v16  ;;  %v510_v29 = vsel %vm190_vm2, %v498_v63, %v499_v20 }
 0x156   :  { %v470_v28 = vpop.f32.mrf.mxu0  ;;  %589 = vrot.lane.b32.xlu1 %v533_v25, %s2555_s18  ;;  %v534_v38 = vsel %vm231_vm1, %v522_v0, %v523_v21  ;;  %v768_v21 = vsel %vm761_vm10, %v2898_v61, %v2945_v23 }
 0x157   :  { %v494_v30 = vmax.f32 %v476_v24, 0.0  ;;  %v471_v31 = vadd.f32 %v2974_v50, %v470_v28 }
 0x159   :  { %v493_v32 = vmax.f32 %v471_v31, 0.0  ;;  %563 = vrot.lane.b32.xlu0 %v494_v30, %s2554_s2  ;;  %v502_v33 = vrot.slane %v494_v30, 7  ;;  %v526_v34 = vrot.slane %v494_v30, 1 }
 0x15b   :  { %v501_v35 = vrot.slane %v493_v32, 7  ;;  %v525_v36 = vrot.slane %v493_v32, 1 }
 0x15c   :  { %v2365_v37 = vpop.f32.mrf.mxu0 }
 0x15d   :  { %v486_v39 = vadd.f32 %v2365_v37, %v2974_v50  ;;  %587 = vrot.lane.b32.xlu0 %v534_v38, %s2555_s18  ;;  %v531_v41 = vsel %vm231_vm1, %v525_v36, %v526_v34  ;;  %v3036_v42 = vsel %vm190_vm2, %v501_v35, %v502_v33  ;;  %v508_v44 = vsel %vm190_vm2, %v500_v16, %v501_v35 }
 0x15e   :  { %v480_v43 = vpop.f32.mrf.mxu0  ;;  %593 = vrot.lane.b32.xlu1 %v531_v41, %s2555_s18  ;;  %v517_v25 = vsel %vm2834_vm9, 0.0, %v508_v44 }
 0x15f   :  { %v496_v45 = vmax.f32 %v486_v39, 0.0  ;;  %v481_v47 = vadd.f32 %v2974_v50, %v480_v43  ;;  %v532_v50 = vsel %vm231_vm1, %v524_v19, %v525_v36 }
 0x160   :  { %v540_v58 = vsel %vm2714_vm3, 0.0, %v532_v50 }
 0x161   :  { %v504_v48 = vrot.slane %v496_v45, 7  ;;  %v495_v49 = vmax.f32 %v481_v47, 0.0  ;;  %561 = vrot.lane.b32.xlu0 %v493_v32, %s2554_s2  ;;  %v528_v51 = vrot.slane %v496_v45, 1 }
 0x162   :  { %749 = vrot.lane.b32.xlu1 %v2937_v17, %s2553_s25 }
 0x163   :  { %v503_v53 = vrot.slane %v495_v49, 7  ;;  %v527_v54 = vrot.slane %v495_v49, 1  ;;  %v512_v55 = vsel %vm190_vm2, %v504_v48, %v497_v1  ;;  %v536_v63 = vsel %vm231_vm1, %v528_v51, %v521_v2 }
 0x164   :  { %v544_v13 = vsel %vm2775_vm4, 0.0, %v536_v63  ;;  %v513_v3 = vsel %vm2814_vm5, 0.0, %v512_v55  ;;  %v1201_v55 = vld [vmem:[%s3709_s6 + $0x18] sm:$0xff]  ;;  %v1198_v63 = vld [vmem:[%s3709_s6] sm:$0xff] }
 0x165   :  { %567 = vrot.lane.b32.xlu0 %v496_v45, %s2554_s2  ;;  %v529_v56 = vsel %vm231_vm1, %v527_v54, %v528_v51  ;;  %v3054_v57 = vsel %vm190_vm2, %v503_v53, %v504_v48  ;;  %v506_v17 = vsel %vm190_vm2, %v502_v33, %v503_v53  ;;  %v530_v62 = vsel %vm231_vm1, %v526_v34, %v527_v54  ;;  %v3123_v48 = vld [vmem:[%s3708_s5] ss:$0 sm:$0xff] }
 0x166   :  { %597 = vrot.lane.b32.xlu1 %v529_v56, %s2555_s18  ;;  %v1202_v51 = vld [vmem:[%s3709_s6 + $0x20] sm:$0xff] }
 0x169   :  { %591 = vrot.lane.b32.xlu0 %v540_v58, %s2555_s18  ;;  %v1200_v58 = vld [vmem:[%s3709_s6 + $0x10] sm:$0xff] }
 0x16a   :  { %751 = vrot.lane.b32.xlu1 %v704_v60, %s2553_s25 }
 0x16d   :  { %565 = vrot.lane.b32.xlu0 %v495_v49, %s2554_s2 }
 0x171   :  { %595 = vrot.lane.b32.xlu0 %v530_v62, %s2555_s18  ;;  %v1199_v62 = vld [vmem:[%s3709_s6 + $0x8] sm:$0xff] }
 0x175   :  { %719 = vrot.lane.b32.xlu0 %v2762_v40, %s2552_s28 }
 0x179   :  { %599 = vrot.lane.b32.xlu0 %v544_v13, %s2555_s18 }
 0x1bb   :  { %v556_v0 = vpop.permute.xlu0 %555 }
 0x1bc   :  { %v611_v12 = vsel %vm609_vm14, %v3007_v9, %v556_v0 }
 0x1bf   :  { %v554_v1 = vpop.permute.xlu0 %553 }
 0x1c0   :  { %v610_v5 = vsel %vm609_vm14, %v513_v3, %v554_v1  ;;  %v586_v40 = vpop.permute.xlu1 %585 }
 0x1c1   :  { %v619_v59 = vsel %vm618_vm13, %v610_v5, %v586_v40 }
 0x1c2   :  { %2408 = vmatprep.mubr.msk.f32.mxu0 %vm770_vm11, %v619_v59 }
 0x1c3   :  { %v560_v2 = vpop.permute.xlu0 %559 }
 0x1c7   :  { %v558_v7 = vpop.permute.xlu0 %557 }
 0x1c8   :  { %v590_v10 = vpop.permute.xlu1 %589  ;;  %v612_v11 = vsel %vm609_vm14, %v510_v29, %v558_v7  ;;  %v613_v29 = vsel %vm609_vm14, %v3021_v26, %v560_v2 }
 0x1c9   :  { %v621_v19 = vsel %vm618_vm13, %v612_v11, %v590_v10 }
 0x1cb   :  { %v564_v8 = vpop.permute.xlu0 %563 }
 0x1cc   :  { %v615_v34 = vsel %vm609_vm14, %v3036_v42, %v564_v8 }
 0x1cf   :  { %v588_v14 = vpop.permute.xlu0 %587 }
 0x1d0   :  { %v620_v15 = vsel %vm618_vm13, %v611_v12, %v588_v14  ;;  %v594_v16 = vpop.permute.xlu1 %593 }
 0x1d1   :  { %2409 = vmatmul.mubr.msk.f32.vlgmr.msra.gmra.mxu0 %vm770_vm11, %v620_v15 }
 0x1d2   :  { %2411 = vmatprep.mubr.msk.f32.mxu0 %vm770_vm11, %v621_v19 }
 0x1d3   :  { %v562_v20 = vpop.permute.xlu0 %561 }
 0x1d4   :  { %v750_v22 = vpop.permute.xlu1 %749  ;;  %v614_v28 = vsel %vm609_vm14, %v517_v25, %v562_v20 }
 0x1d5   :  { %v777_v24 = vsel %vm770_vm11, %v768_v21, %v750_v22  ;;  %v623_v61 = vsel %vm618_vm13, %v614_v28, %v594_v16 }
 0x1d6   :  { %2393 = vmatprep.mubr.msk.f32.mxu1 %vm788_vm12, %v777_v24 }
 0x1d7   :  { %v568_v9 = vpop.permute.xlu0 %567 }
 0x1d8   :  { %v598_v32 = vpop.permute.xlu1 %597  ;;  %v617_v42 = vsel %vm609_vm14, %v3054_v57, %v568_v9 }
 0x1da   :  { %v2386_v45 = vpop.f32.mrf.mxu1 }
 0x1db   :  { %v592_v30 = vpop.permute.xlu0 %591 }
 0x1dc   :  { %v622_v31 = vsel %vm618_vm13, %v613_v29, %v592_v30  ;;  %v752_v38 = vpop.permute.xlu1 %751  ;;  %v879_v53 = vpop.f32.mrf.mxu1 }
 0x1dd   :  { %2412 = vmatmul.mubr.msk.f32.gmra.mxu0 %vm770_vm11, %v622_v31 }
 0x1de   :  { %2414 = vmatprep.mubr.msk.f32.mxu0 %vm770_vm11, %v623_v61 }
 0x1df   :  { %v566_v23 = vpop.permute.xlu0 %565 }
 0x1e0   :  { %v616_v33 = vsel %vm609_vm14, %v506_v17, %v566_v23 }
 0x1e1   :  { %v625_v26 = vsel %vm618_vm13, %v616_v33, %v598_v32 }
 0x1e3   :  { %v596_v35 = vpop.permute.xlu0 %595 }
 0x1e4   :  { %v624_v36 = vsel %vm618_vm13, %v615_v34, %v596_v35 }
 0x1e5   :  { %2415 = vmatmul.mubr.msk.f32.gmra.mxu0 %vm770_vm11, %v624_v36 }
 0x1e6   :  { %2417 = vmatprep.mubr.msk.f32.mxu0 %vm770_vm11, %v625_v26 }
 0x1e7   :  { %v720_v37 = vpop.permute.xlu0 %719 }
 0x1e8   :  { %v769_v39 = vsel %vm761_vm10, %v2941_v18, %v720_v37  ;;  %v1203_v18 = vld [vmem:[%s3709_s6 + $0x28] sm:$0xff] }
 0x1e9   :  { %v778_v41 = vsel %vm770_vm11, %v769_v39, %v752_v38  ;;  %2420 = vmatprep.subr.mxu1 %v1203_v18 }
 0x1ea   :  { %2394 = vmatmul.mubr.msk.f32.gmra.mxu1 %vm788_vm12, %v778_v41  ;;  %v2389_v5 = vpop.f32.mrf.mxu1 }
 0x1eb   :  { %v600_v43 = vpop.permute.xlu0 %599  ;;  %2421 = vmatpush3.msra.mxu1 %v1203_v18 }
 0x1ec   :  { %v626_v44 = vsel %vm618_vm13, %v617_v42, %v600_v43  ;;  %2422 = vmatprep.subr.mxu1 %v1202_v51  ;;  %v889_v8 = vpop.f32.mrf.mxu1 }
 0x1ed   :  { %2418 = vmatmul.mubr.msk.f32.gmra.mxu0 %vm770_vm11, %v626_v44  ;;  %2423 = vmatpush3.msra.mxu1 %v1202_v51 }
 0x1ee   :  { %2424 = vmatprep.subr.mxu1 %v1201_v55  ;;  %v2392_v16 = vpop.f32.mrf.mxu1 }
 0x1ef   :  { %2425 = vmatpush3.msra.mxu1 %v1201_v55 }
 0x1f0   :  { %2426 = vmatprep.subr.mxu1 %v1200_v58  ;;  %v899_v25 = vpop.f32.mrf.mxu1 }
 0x1f1   :  { %2427 = vmatpush3.msra.mxu1 %v1200_v58 }
 0x1f2   :  { %2428 = vmatprep.subr.mxu1 %v1199_v62 }
 0x1f3   :  { %2429 = vmatpush3.msra.mxu1 %v1199_v62 }
 0x1f4   :  { %2430 = vmatprep.subr.mxu1 %v1198_v63 }
 0x1f5   :  { %2431 = vmatpush3.msra.mxu1 %v1198_v63 }
 0x291   :  { %v2410_v47 = vpop.f32.mrf.mxu0 }
 0x292   :  { %v1014_v49 = vadd.f32 %v2410_v47, %v2386_v45 }
 0x293   :  { %v1008_v54 = vpop.f32.mrf.mxu0 }
 0x294   :  { %v1055_v56 = vadd.f32 %v3123_v48, %v1014_v49  ;;  %v1009_v50 = vadd.f32 %v1008_v54, %v879_v53 }
 0x296   :  { %v1063_v57 = vmax.f32 %v1055_v56, 0.0  ;;  %v1054_v17 = vadd.f32 %v3123_v48, %v1009_v50 }
 0x298   :  { %v3139_v60 = vmax.f32 %v1054_v17, 0.0  ;;  %1128 = vrot.lane.b32.xlu1 %v1063_v57, %s2554_s2  ;;  %v1071_v13 = vrot.slane %v1063_v57, 7  ;;  %v1095_v3 = vrot.slane %v1063_v57, 1 }
 0x29a   :  { %v1070_v0 = vrot.slane %v3139_v60, 7  ;;  %1126 = vrot.lane.b32.xlu0 %v3139_v60, %s2554_s2  ;;  %v1094_v1 = vrot.slane %v3139_v60, 1 }
 0x29c   :  { %v1108_v40 = vsel %vm231_vm1, %v1094_v1, %v1095_v3  ;;  %v3160_v59 = vsel %vm190_vm2, %v1070_v0, %v1071_v13 }
 0x29d   :  { %v2413_v2 = vpop.f32.mrf.mxu0 }
 0x29e   :  { %v1024_v7 = vadd.f32 %v2413_v2, %v2389_v5  ;;  %1158 = vrot.lane.b32.xlu0 %v1108_v40, %s2555_s18 }
 0x29f   :  { %v1018_v10 = vpop.f32.mrf.mxu0 }
 0x2a0   :  { %v1057_v11 = vadd.f32 %v3123_v48, %v1024_v7  ;;  %v1019_v12 = vadd.f32 %v1018_v10, %v889_v8 }
 0x2a2   :  { %v1065_v14 = vmax.f32 %v1057_v11, 0.0  ;;  %v1056_v15 = vadd.f32 %v3123_v48, %v1019_v12 }
 0x2a4   :  { %v1064_v19 = vmax.f32 %v1056_v15, 0.0  ;;  %1132 = vrot.lane.b32.xlu1 %v1065_v14, %s2554_s2  ;;  %v1097_v9 = vrot.slane %v1065_v14, 1  ;;  %v1073_v28 = vrot.slane %v1065_v14, 7 }
 0x2a5   :  { %v2416_v20 = vpop.f32.mrf.mxu0 }
 0x2a6   :  { %v1072_v21 = vrot.slane %v1064_v19, 7  ;;  %v1034_v22 = vadd.f32 %v2416_v20, %v2392_v16  ;;  %1130 = vrot.lane.b32.xlu0 %v1064_v19, %s2554_s2  ;;  %v1096_v24 = vrot.slane %v1064_v19, 1 }
 0x2a7   :  { %v1028_v29 = vpop.f32.mrf.mxu0 }
 0x2a8   :  { %v1059_v30 = vadd.f32 %v3123_v48, %v1034_v22  ;;  %v1029_v31 = vadd.f32 %v1028_v29, %v899_v25  ;;  %v1107_v61 = vsel %vm231_vm1, %v1095_v3, %v1096_v24  ;;  %v1106_v23 = vsel %vm231_vm1, %v1096_v24, %v1097_v9 }
 0x2a9   :  { %1160 = vrot.lane.b32.xlu1 %v1107_v61, %s2555_s18  ;;  %v3175_v32 = vsel %vm190_vm2, %v1072_v21, %v1073_v28  ;;  %v1083_v33 = vsel %vm190_vm2, %v1071_v13, %v1072_v21 }
 0x2aa   :  { %v1067_v34 = vmax.f32 %v1059_v30, 0.0  ;;  %v1058_v35 = vadd.f32 %v3123_v48, %v1029_v31  ;;  %1162 = vrot.lane.b32.xlu0 %v1106_v23, %s2555_s18  ;;  %v2395_v36 = vpop.f32.mrf.mxu1 }
 0x2ac   :  { %v1066_v26 = vmax.f32 %v1058_v35, 0.0  ;;  %v1099_v42 = vrot.slane %v1067_v34, 1  ;;  %v1075_v43 = vrot.slane %v1067_v34, 7  ;;  %v909_v44 = vpop.f32.mrf.mxu1 }
 0x2ad   :  { %v2419_v37 = vpop.f32.mrf.mxu0 }
 0x2ae   :  { %v1074_v38 = vrot.slane %v1066_v26, 7  ;;  %v1044_v39 = vadd.f32 %v2419_v37, %v2395_v36  ;;  %1134 = vrot.lane.b32.xlu0 %v1066_v26, %s2554_s2  ;;  %v1098_v41 = vrot.slane %v1066_v26, 1 }
 0x2af   :  { %v1038_v45 = vpop.f32.mrf.mxu0 }
 0x2b0   :  { %v1061_v47 = vadd.f32 %v3123_v48, %v1044_v39  ;;  %v1039_v18 = vadd.f32 %v1038_v45, %v909_v44  ;;  %v1105_v49 = vsel %vm231_vm1, %v1097_v9, %v1098_v41  ;;  %v1104_v51 = vsel %vm231_vm1, %v1098_v41, %v1099_v42  ;;  %v1486_v44 = vld [vmem:[%s3710_s8 + $0x48] sm:$0xff]  ;;  %v1485_v45 = vld [vmem:[%s3710_s8 + $0x40] sm:$0xff] }
 0x2b1   :  { %v1113_v53 = vsel %vm2714_vm3, 0.0, %v1105_v49  ;;  %v1081_v54 = vsel %vm190_vm2, %v1073_v28, %v1074_v38  ;;  %v1080_v55 = vsel %vm190_vm2, %v1074_v38, %v1075_v43  ;;  %v1482_v49 = vld [vmem:[%s3710_s8 + $0x28] sm:$0xff] }
 0x2b2   :  { %v1069_v56 = vmax.f32 %v1061_v47, 0.0  ;;  %v1060_v50 = vadd.f32 %v3123_v48, %v1039_v18  ;;  %1164 = vrot.lane.b32.xlu1 %v1113_v53, %s2555_s18  ;;  %1166 = vrot.lane.b32.xlu0 %v1104_v51, %s2555_s18  ;;  %v1090_v9 = vsel %vm2834_vm9, 0.0, %v1081_v54  ;;  %v1484_v47 = vld [vmem:[%s3710_s8 + $0x38] sm:$0xff]  ;;  %v1483_v18 = vld [vmem:[%s3710_s8 + $0x30] sm:$0xff] }
 0x2b3   :  { %v1481_v51 = vld [vmem:[%s3710_s8 + $0x20] sm:$0xff]  ;;  %v1480_v54 = vld [vmem:[%s3710_s8 + $0x18] sm:$0xff] }
 0x2b4   :  { %v1077_v57 = vrot.slane %v1069_v56, 7  ;;  %v1068_v17 = vmax.f32 %v1060_v50, 0.0  ;;  %v1101_v63 = vrot.slane %v1069_v56, 1  ;;  %v3277_v53 = vld [vmem:[%s3711_s7] ss:$0 sm:$0xff] }
 0x2b6   :  { %v1076_v58 = vrot.slane %v1068_v17, 7  ;;  %1136 = vrot.lane.b32.xlu1 %v1067_v34, %s2554_s2  ;;  %1138 = vrot.lane.b32.xlu0 %v1068_v17, %s2554_s2  ;;  %v1100_v62 = vrot.slane %v1068_v17, 1  ;;  %v1085_v13 = vsel %vm190_vm2, %v1077_v57, %v1070_v0  ;;  %v1109_v0 = vsel %vm231_vm1, %v1101_v63, %v1094_v1 }
 0x2b7   :  { %v1117_v2 = vsel %vm2775_vm4, 0.0, %v1109_v0  ;;  %v1086_v8 = vsel %vm2814_vm5, 0.0, %v1085_v13 }
 0x2b8   :  { %v1103_v48 = vsel %vm231_vm1, %v1099_v42, %v1100_v62  ;;  %v1102_v3 = vsel %vm231_vm1, %v1100_v62, %v1101_v63  ;;  %v1079_v5 = vsel %vm190_vm2, %v1075_v43, %v1076_v58  ;;  %v1078_v40 = vsel %vm190_vm2, %v1076_v58, %v1077_v57  ;;  %v1488_v42 = vld [vmem:[%s3710_s8 + $0x58] sm:$0xff]  ;;  %v1487_v43 = vld [vmem:[%s3710_s8 + $0x50] sm:$0xff]  ;;  %v1478_v62 = vld [vmem:[%s3710_s8 + $0x8] sm:$0xff] }
 0x2b9   :  { %2444 = vmatprep.subr.mxu0 %v1488_v42  ;;  %v1477_v63 = vld [vmem:[%s3710_s8] sm:$0xff] }
 0x2ba   :  { %1168 = vrot.lane.b32.xlu1 %v1103_v48, %s2555_s18  ;;  %1170 = vrot.lane.b32.xlu0 %v1102_v3, %s2555_s18 }
 0x2bb   :  { %2445 = vmatpush3.msra.mxu0 %v1488_v42 }
 0x2bc   :  { %2446 = vmatprep.subr.mxu0 %v1487_v43 }
 0x2bd   :  { %2447 = vmatpush3.msra.mxu0 %v1487_v43 }
 0x2be   :  { %1140 = vrot.lane.b32.xlu1 %v1069_v56, %s2554_s2  ;;  %2448 = vmatprep.subr.mxu0 %v1486_v44 }
 0x2bf   :  { %2449 = vmatpush3.msra.mxu0 %v1486_v44 }
 0x2c0   :  { %2450 = vmatprep.subr.mxu0 %v1485_v45 }
 0x2c1   :  { %2451 = vmatpush3.msra.mxu0 %v1485_v45 }
 0x2c2   :  { %1172 = vrot.lane.b32.xlu1 %v1117_v2, %s2555_s18  ;;  %2452 = vmatprep.subr.mxu0 %v1484_v47 }
 0x2c3   :  { %2453 = vmatpush3.msra.mxu0 %v1484_v47 }
 0x2c4   :  { %2454 = vmatprep.subr.mxu0 %v1483_v18 }
 0x2c5   :  { %2455 = vmatpush3.msra.mxu0 %v1483_v18 }
 0x2c6   :  { %2456 = vmatprep.subr.mxu0 %v1482_v49 }
 0x2c7   :  { %2457 = vmatpush3.msra.mxu0 %v1482_v49 }
 0x2c8   :  { %2458 = vmatprep.subr.mxu0 %v1481_v51 }
 0x2c9   :  { %2459 = vmatpush3.msra.mxu0 %v1481_v51 }
 0x2ca   :  { %2460 = vmatprep.subr.mxu0 %v1480_v54 }
 0x2cb   :  { %2461 = vmatpush3.msra.mxu0 %v1480_v54 }
 0x30a   :  { %v1129_v14 = vpop.permute.xlu1 %1128 }
 0x30b   :  { %v1183_v1 = vsel %vm609_vm14, %v3160_v59, %v1129_v14 }
 0x30c   :  { %v1127_v7 = vpop.permute.xlu0 %1126 }
 0x30d   :  { %v1182_v10 = vsel %vm609_vm14, %v1086_v8, %v1127_v7 }
 0x310   :  { %v1159_v11 = vpop.permute.xlu0 %1158 }
 0x311   :  { %v1190_v12 = vsel %vm618_vm13, %v1182_v10, %v1159_v11 }
 0x312   :  { %2432 = vmatprep.mubr.msk.f32.mxu1 %vm770_vm11, %v1190_v12 }
 0x316   :  { %v1133_v60 = vpop.permute.xlu1 %1132 }
 0x317   :  { %v1185_v25 = vsel %vm609_vm14, %v3175_v32, %v1133_v60 }
 0x318   :  { %v1131_v15 = vpop.permute.xlu0 %1130 }
 0x319   :  { %v1184_v19 = vsel %vm609_vm14, %v1083_v33, %v1131_v15 }
 0x31b   :  { %v1161_v16 = vpop.permute.xlu1 %1160 }
 0x31c   :  { %v1191_v20 = vsel %vm618_vm13, %v1183_v1, %v1161_v16  ;;  %v1163_v21 = vpop.permute.xlu0 %1162 }
 0x31d   :  { %v1192_v22 = vsel %vm618_vm13, %v1184_v19, %v1163_v21  ;;  %2433 = vmatmul.mubr.msk.f32.vlgmr.msra.gmra.mxu1 %vm770_vm11, %v1191_v20 }
 0x31e   :  { %2435 = vmatprep.mubr.msk.f32.mxu1 %vm770_vm11, %v1192_v22 }
 0x320   :  { %v1135_v24 = vpop.permute.xlu0 %1134 }
 0x321   :  { %v1186_v59 = vsel %vm609_vm14, %v1090_v9, %v1135_v24 }
 0x324   :  { %v1165_v28 = vpop.permute.xlu1 %1164  ;;  %v1167_v29 = vpop.permute.xlu0 %1166 }
 0x325   :  { %v1193_v30 = vsel %vm618_vm13, %v1185_v25, %v1165_v28  ;;  %v1194_v31 = vsel %vm618_vm13, %v1186_v59, %v1167_v29 }
 0x326   :  { %2436 = vmatmul.mubr.msk.f32.gmra.mxu1 %vm770_vm11, %v1193_v30 }
 0x327   :  { %2438 = vmatprep.mubr.msk.f32.mxu1 %vm770_vm11, %v1194_v31 }
 0x328   :  { %v1137_v61 = vpop.permute.xlu1 %1136  ;;  %v1139_v23 = vpop.permute.xlu0 %1138 }
 0x329   :  { %v1187_v33 = vsel %vm609_vm14, %v1080_v55, %v1137_v61  ;;  %v1188_v34 = vsel %vm609_vm14, %v1079_v5, %v1139_v23  ;;  %v1479_v55 = vld [vmem:[%s3710_s8 + $0x10] sm:$0xff]  ;;  %s2556_s8 = smov 64  }
 0x32a   :  { %2462 = vmatprep.subr.mxu0 %v1479_v55 }
 0x32b   :  { %2463 = vmatpush3.msra.mxu0 %v1479_v55 }
 0x32c   :  { %v1169_v35 = vpop.permute.xlu1 %1168  ;;  %v1171_v32 = vpop.permute.xlu0 %1170  ;;  %2464 = vmatprep.subr.mxu0 %v1478_v62 }
 0x32d   :  { %v1195_v36 = vsel %vm618_vm13, %v1187_v33, %v1169_v35  ;;  %v1196_v26 = vsel %vm618_vm13, %v1188_v34, %v1171_v32  ;;  %2465 = vmatpush3.msra.mxu0 %v1478_v62 }
 0x32e   :  { %2439 = vmatmul.mubr.msk.f32.gmra.mxu1 %vm770_vm11, %v1195_v36  ;;  %2466 = vmatprep.subr.mxu0 %v1477_v63 }
 0x32f   :  { %2441 = vmatprep.mubr.msk.f32.mxu1 %vm770_vm11, %v1196_v26  ;;  %2467 = vmatpush3.msra.mxu0 %v1477_v63 }
 0x330   :  { %v1141_v37 = vpop.permute.xlu1 %1140 }
 0x331   :  { %v1189_v38 = vsel %vm609_vm14, %v1078_v40, %v1141_v37 }
 0x334   :  { %v1173_v39 = vpop.permute.xlu1 %1172 }
 0x335   :  { %v1197_v41 = vsel %vm618_vm13, %v1189_v38, %v1173_v39 }
 0x336   :  { %2442 = vmatmul.mubr.msk.f32.gmra.mxu1 %vm770_vm11, %v1197_v41 }
 0x3dd   :  { %v2434_v56 = vpop.f32.mrf.mxu1 }
 0x3de   :  { %v1307_v50 = vadd.f32 %v2434_v56, %v3277_v53 }
 0x3df   :  { %v1301_v57 = vpop.f32.mrf.mxu1 }
 0x3e0   :  { %v1341_v17 = vmax.f32 %v1307_v50, 0.0  ;;  %v1302_v58 = vadd.f32 %v3277_v53, %v1301_v57 }
 0x3e2   :  { %v3293_v13 = vmax.f32 %v1302_v58, 0.0  ;;  %1406 = vrot.lane.b32.xlu1 %v1341_v17, %s2555_s18  ;;  %v1349_v48 = vrot.slane %v1341_v17, 7  ;;  %v1373_v3 = vrot.slane %v1341_v17, 1 }
 0x3e4   :  { %v1348_v5 = vrot.slane %v3293_v13, 7  ;;  %v1372_v40 = vrot.slane %v3293_v13, 1  ;;  %1404 = vrot.lane.b32.xlu0 %v3293_v13, %s2555_s18 }
 0x3e6   :  { %v2437_v0 = vpop.f32.mrf.mxu1  ;;  %v1386_v2 = vsel %vm231_vm1, %v1372_v40, %v1373_v3  ;;  %v3306_v7 = vsel %vm190_vm2, %v1348_v5, %v1349_v48 }
 0x3e7   :  { %v1317_v8 = vadd.f32 %v2437_v0, %v3277_v53 }
 0x3e8   :  { %v1311_v10 = vpop.f32.mrf.mxu1  ;;  %1436 = vrot.lane.b32.xlu0 %v1386_v2, %s2556_s8 }
 0x3e9   :  { %v1343_v11 = vmax.f32 %v1317_v8, 0.0  ;;  %v1312_v12 = vadd.f32 %v3277_v53, %v1311_v10 }
 0x3eb   :  { %v1342_v14 = vmax.f32 %v1312_v12, 0.0  ;;  %v1375_v60 = vrot.slane %v1343_v11, 1  ;;  %v1351_v16 = vrot.slane %v1343_v11, 7 }
 0x3ed   :  { %v1350_v15 = vrot.slane %v1342_v14, 7  ;;  %v1374_v1 = vrot.slane %v1342_v14, 1  ;;  %1408 = vrot.lane.b32.xlu0 %v1342_v14, %s2555_s18 }
 0x3ee   :  { %v2440_v19 = vpop.f32.mrf.mxu1 }
 0x3ef   :  { %v1327_v20 = vadd.f32 %v2440_v19, %v3277_v53  ;;  %v1385_v21 = vsel %vm231_vm1, %v1373_v3, %v1374_v1  ;;  %v1384_v22 = vsel %vm231_vm1, %v1374_v1, %v1375_v60  ;;  %v1361_v24 = vsel %vm190_vm2, %v1349_v48, %v1350_v15 }
 0x3f0   :  { %v1321_v9 = vpop.f32.mrf.mxu1  ;;  %1438 = vrot.lane.b32.xlu1 %v1385_v21, %s2556_s8  ;;  %v3322_v25 = vsel %vm190_vm2, %v1350_v15, %v1351_v16 }
 0x3f1   :  { %v1345_v59 = vmax.f32 %v1327_v20, 0.0  ;;  %v1322_v28 = vadd.f32 %v3277_v53, %v1321_v9  ;;  %1440 = vrot.lane.b32.xlu0 %v1384_v22, %s2556_s8 }
 0x3f3   :  { %v1344_v29 = vmax.f32 %v1322_v28, 0.0  ;;  %v1377_v30 = vrot.slane %v1345_v59, 1  ;;  %v1353_v23 = vrot.slane %v1345_v59, 7 }
 0x3f4   :  { %1410 = vrot.lane.b32.xlu1 %v1343_v11, %s2555_s18 }
 0x3f5   :  { %v1352_v31 = vrot.slane %v1344_v29, 7  ;;  %v1376_v61 = vrot.slane %v1344_v29, 1  ;;  %1412 = vrot.lane.b32.xlu0 %v1344_v29, %s2555_s18 }
 0x3f6   :  { %v2443_v33 = vpop.f32.mrf.mxu1 }
 0x3f7   :  { %v1337_v34 = vadd.f32 %v2443_v33, %v3277_v53  ;;  %v1383_v35 = vsel %vm231_vm1, %v1375_v60, %v1376_v61  ;;  %v1382_v32 = vsel %vm231_vm1, %v1376_v61, %v1377_v30  ;;  %v1359_v36 = vsel %vm190_vm2, %v1351_v16, %v1352_v31  ;;  %v1737_v61 = vld [vmem:[%s3712_s10 + $0x78] sm:$0xff]  ;;  %v1735_v33 = vld [vmem:[%s3712_s10 + $0x68] sm:$0xff] }
 0x3f8   :  { %v1331_v26 = vpop.f32.mrf.mxu1  ;;  %v1391_v37 = vsel %vm2714_vm3, 0.0, %v1383_v35  ;;  %v1358_v38 = vsel %vm190_vm2, %v1352_v31, %v1353_v23  ;;  %v1368_v11 = vsel %vm2834_vm9, 0.0, %v1359_v36  ;;  %v2557_v31 = vmov 0.0   ;;  %v1733_v35 = vld [vmem:[%s3712_s10 + $0x58] sm:$0xff]  ;;  %v1731_v36 = vld [vmem:[%s3712_s10 + $0x48] sm:$0xff] }
 0x3f9   :  { %v1347_v39 = vmax.f32 %v1337_v34, 0.0  ;;  %v1332_v41 = vadd.f32 %v3277_v53, %v1331_v26  ;;  %1442 = vrot.lane.b32.xlu1 %v1391_v37, %s2556_s8  ;;  %1444 = vrot.lane.b32.xlu0 %v1382_v32, %s2556_s8  ;;  %v1734_v34 = vld [vmem:[%s3712_s10 + $0x60] sm:$0xff]  ;;  %v1732_v32 = vld [vmem:[%s3712_s10 + $0x50] sm:$0xff] }
 0x3fa   :  { %1777 = vmatprep.subr.mxu1 %v2557_v31  ;;  %v1730_v26 = vld [vmem:[%s3712_s10 + $0x40] sm:$0xff]  ;;  %v1729_v37 = vld [vmem:[%s3712_s10 + $0x38] sm:$0xff] }
 0x3fb   :  { %v1355_v42 = vrot.slane %v1347_v39, 7  ;;  %v1346_v43 = vmax.f32 %v1332_v41, 0.0  ;;  %v1379_v44 = vrot.slane %v1347_v39, 1  ;;  %1778 = vmatpush1.msra.mxu1 %v1737_v61  ;;  %v1726_v41 = vld [vmem:[%s3712_s10 + $0x20] sm:$0xff] }
 0x3fc   :  { %1779 = vmatprep.subr.mxu1 %v2557_v31 }
 0x3fd   :  { %v1354_v45 = vrot.slane %v1346_v43, 7  ;;  %v1378_v47 = vrot.slane %v1346_v43, 1  ;;  %1414 = vrot.lane.b32.xlu1 %v1345_v59, %s2555_s18  ;;  %1416 = vrot.lane.b32.xlu0 %v1346_v43, %s2555_s18  ;;  %v1363_v18 = vsel %vm190_vm2, %v1355_v42, %v1348_v5  ;;  %v1387_v55 = vsel %vm231_vm1, %v1379_v44, %v1372_v40  ;;  %v1724_v43 = vld [vmem:[%s3712_s10 + $0x10] sm:$0xff] }
 0x3fe   :  { %v1395_v56 = vsel %vm2775_vm4, 0.0, %v1387_v55  ;;  %v1364_v57 = vsel %vm2814_vm5, 0.0, %v1363_v18  ;;  %v1744_v18 = vld [vmem:[%s3712_s10 + $0xb0] sm:$0xff]  ;;  %v1739_v55 = vld [vmem:[%s3712_s10 + $0x88] sm:$0xff] }
 0x3ff   :  { %v1381_v49 = vsel %vm231_vm1, %v1377_v30, %v1378_v47  ;;  %v1380_v51 = vsel %vm231_vm1, %v1378_v47, %v1379_v44  ;;  %v1357_v53 = vsel %vm190_vm2, %v1353_v23, %v1354_v45  ;;  %v1356_v54 = vsel %vm190_vm2, %v1354_v45, %v1355_v42  ;;  %v1736_v23 = vld [vmem:[%s3712_s10 + $0x70] sm:$0xff]  ;;  %v1725_v42 = vld [vmem:[%s3712_s10 + $0x18] sm:$0xff]  ;;  %v1723_v44 = vld [vmem:[%s3712_s10 + $0x8] sm:$0xff] }
 0x400   :  { %1780 = vmatpush1.msra.mxu1 %v1736_v23  ;;  %v1722_v45 = vld [vmem:[%s3712_s10] sm:$0xff]  ;;  %v1745_v47 = vld [vmem:[%s3712_s10 + $0xb8] sm:$0xff] }
 0x401   :  { %1446 = vrot.lane.b32.xlu1 %v1381_v49, %s2556_s8  ;;  %1448 = vrot.lane.b32.xlu0 %v1380_v51, %s2556_s8  ;;  %v1743_v49 = vld [vmem:[%s3712_s10 + $0xa8] sm:$0xff]  ;;  %v1742_v51 = vld [vmem:[%s3712_s10 + $0xa0] sm:$0xff] }
 0x402   :  { %1781 = vmatprep.subr.mxu1 %v2557_v31 }
 0x403   :  { %1782 = vmatpush1.msra.mxu1 %v1735_v33 }
 0x404   :  { %1783 = vmatprep.subr.mxu1 %v2557_v31 }
 0x405   :  { %1418 = vrot.lane.b32.xlu1 %v1347_v39, %s2555_s18  ;;  %1784 = vmatpush1.msra.mxu1 %v1734_v34  ;;  %v1727_v39 = vld [vmem:[%s3712_s10 + $0x28] sm:$0xff]  ;;  %v1905_v34 = vld [vmem:[%s3714_s12 + $0x78] sm:$0xff] }
 0x406   :  { %1785 = vmatprep.subr.mxu1 %v2557_v31  ;;  %2480 = vmatprep.subr.mxu0 %v1905_v34 }
 0x407   :  { %1786 = vmatpush1.msra.mxu1 %v1733_v35  ;;  %v1904_v35 = vld [vmem:[%s3714_s12 + $0x70] sm:$0xff] }
 0x408   :  { %1787 = vmatprep.subr.mxu1 %v2557_v31 }
 0x409   :  { %1450 = vrot.lane.b32.xlu1 %v1395_v56, %s2556_s8  ;;  %1788 = vmatpush1.msra.mxu1 %v1732_v32  ;;  %v1738_v56 = vld [vmem:[%s3712_s10 + $0x80] sm:$0xff] }
 0x40a   :  { %1789 = vmatprep.subr.mxu1 %v2557_v31 }
 0x40b   :  { %1790 = vmatpush1.msra.mxu1 %v1731_v36 }
 0x40c   :  { %1791 = vmatprep.subr.mxu1 %v2557_v31 }
 0x40d   :  { %1792 = vmatpush1.msra.mxu1 %v1730_v26 }
 0x40e   :  { %1793 = vmatprep.subr.mxu1 %v2557_v31 }
 0x40f   :  { %1794 = vmatpush1.msra.mxu1 %v1729_v37 }
 0x410   :  { %1795 = vmatprep.subr.mxu1 %v2557_v31 }
 0x454   :  { %v1407_v63 = vpop.permute.xlu1 %1406 }
 0x455   :  { %v1461_v48 = vsel %vm618_vm13, %v3306_v7, %v1407_v63 }
 0x456   :  { %v1405_v50 = vpop.permute.xlu0 %1404 }
 0x457   :  { %v1460_v17 = vsel %vm618_vm13, %v1364_v57, %v1405_v50  ;;  %v2213_v50 = vld [vmem:[%s3713_s9] ss:$0 sm:$0xff] }
 0x45a   :  { %v1437_v58 = vpop.permute.xlu0 %1436 }
 0x45b   :  { %v1469_v62 = vsel %vm1468_vm15, %v1460_v17, %v1437_v58 }
 0x45c   :  { %2468 = vmatprep.mubr.msk.f32.mxu0 %vm1496_vm0, %v1469_v62 }
 0x45f   :  { %v1409_v13 = vpop.permute.xlu0 %1408 }
 0x460   :  { %v1462_v5 = vsel %vm618_vm13, %v1361_v24, %v1409_v13 }
 0x462   :  { %v1439_v3 = vpop.permute.xlu1 %1438 }
 0x463   :  { %v1470_v40 = vsel %vm1468_vm15, %v1461_v48, %v1439_v3  ;;  %v1441_v0 = vpop.permute.xlu0 %1440 }
 0x464   :  { %v1471_v2 = vsel %vm1468_vm15, %v1462_v5, %v1441_v0  ;;  %2469 = vmatmul.mubr.msk.f32.vlgmr.msra.gmra.mxu0 %vm1496_vm0, %v1470_v40 }
 0x465   :  { %2471 = vmatprep.mubr.msk.f32.mxu0 %vm1496_vm0, %v1471_v2  ;;  %2481 = vmatpush3.msra.mxu0 %v1905_v34 }
 0x466   :  { %v1411_v8 = vpop.permute.xlu1 %1410  ;;  %2482 = vmatprep.subr.mxu0 %v1904_v35 }
 0x467   :  { %v1413_v10 = vpop.permute.xlu0 %1412  ;;  %v1463_v7 = vsel %vm618_vm13, %v3322_v25, %v1411_v8  ;;  %2483 = vmatpush3.msra.mxu0 %v1904_v35 }
 0x468   :  { %v1464_v12 = vsel %vm618_vm13, %v1368_v11, %v1413_v10 }
 0x46b   :  { %v1443_v14 = vpop.permute.xlu1 %1442  ;;  %v1445_v60 = vpop.permute.xlu0 %1444 }
 0x46c   :  { %v1472_v15 = vsel %vm1468_vm15, %v1463_v7, %v1443_v14  ;;  %v1473_v1 = vsel %vm1468_vm15, %v1464_v12, %v1445_v60 }
 0x46d   :  { %2472 = vmatmul.mubr.msk.f32.gmra.mxu0 %vm1496_vm0, %v1472_v15 }
 0x46e   :  { %2474 = vmatprep.mubr.msk.f32.mxu0 %vm1496_vm0, %v1473_v1 }
 0x46f   :  { %v1415_v16 = vpop.permute.xlu1 %1414  ;;  %v1417_v19 = vpop.permute.xlu0 %1416 }
 0x470   :  { %v1465_v20 = vsel %vm618_vm13, %v1358_v38, %v1415_v16  ;;  %v1466_v21 = vsel %vm618_vm13, %v1357_v53, %v1417_v19  ;;  %v1728_v38 = vld [vmem:[%s3712_s10 + $0x30] sm:$0xff]  ;;  %v1741_v53 = vld [vmem:[%s3712_s10 + $0x98] sm:$0xff] }
 0x471   :  { %1796 = vmatpush1.msra.mxu1 %v1728_v38 }
 0x472   :  { %1797 = vmatprep.subr.mxu1 %v2557_v31 }
 0x473   :  { %v1447_v22 = vpop.permute.xlu1 %1446  ;;  %v1449_v24 = vpop.permute.xlu0 %1448  ;;  %1798 = vmatpush1.msra.mxu1 %v1727_v39 }
 0x474   :  { %v1474_v9 = vsel %vm1468_vm15, %v1465_v20, %v1447_v22  ;;  %v1475_v25 = vsel %vm1468_vm15, %v1466_v21, %v1449_v24  ;;  %1799 = vmatprep.subr.mxu1 %v2557_v31 }
 0x475   :  { %2475 = vmatmul.mubr.msk.f32.gmra.mxu0 %vm1496_vm0, %v1474_v9  ;;  %1800 = vmatpush1.msra.mxu1 %v1726_v41  ;;  %v1903_v41 = vld [vmem:[%s3714_s12 + $0x68] sm:$0xff] }
 0x476   :  { %2477 = vmatprep.mubr.msk.f32.mxu0 %vm1496_vm0, %v1475_v25  ;;  %1801 = vmatprep.subr.mxu1 %v2557_v31 }
 0x477   :  { %v1419_v59 = vpop.permute.xlu1 %1418  ;;  %1802 = vmatpush1.msra.mxu1 %v1725_v42  ;;  %2484 = vmatprep.subr.mxu0 %v1903_v41 }
 0x478   :  { %v1467_v28 = vsel %vm618_vm13, %v1356_v54, %v1419_v59  ;;  %1803 = vmatprep.subr.mxu1 %v2557_v31  ;;  %v1740_v54 = vld [vmem:[%s3712_s10 + $0x90] sm:$0xff]  ;;  %2485 = vmatpush3.msra.mxu0 %v1903_v41 }
 0x479   :  { %1804 = vmatpush1.msra.mxu1 %v1724_v43 }
 0x47a   :  { %1805 = vmatprep.subr.mxu1 %v2557_v31 }
 0x47b   :  { %v1451_v29 = vpop.permute.xlu1 %1450  ;;  %1806 = vmatpush1.msra.mxu1 %v1723_v44  ;;  %v1902_v44 = vld [vmem:[%s3714_s12 + $0x60] sm:$0xff] }
 0x47c   :  { %v1476_v30 = vsel %vm1468_vm15, %v1467_v28, %v1451_v29  ;;  %1807 = vmatprep.subr.mxu1 %v2557_v31  ;;  %2486 = vmatprep.subr.mxu0 %v1902_v44 }
 0x47d   :  { %2478 = vmatmul.mubr.msk.f32.gmra.mxu0 %vm1496_vm0, %v1476_v30  ;;  %1808 = vmatpush1.msra.mxu1 %v1722_v45 }
 0x47e   :  { %1825 = vmatprep.subr.mxu1 %v2557_v31  ;;  %2487 = vmatpush3.msra.mxu0 %v1902_v44 }
 0x47f   :  { %1826 = vmatpush2.msra.mxu1 %v1745_v47 }
 0x480   :  { %1827 = vmatprep.subr.mxu1 %v2557_v31 }
 0x481   :  { %1828 = vmatpush2.msra.mxu1 %v1744_v18 }
 0x482   :  { %1829 = vmatprep.subr.mxu1 %v2557_v31 }
 0x483   :  { %1830 = vmatpush2.msra.mxu1 %v1743_v49  ;;  %v1901_v49 = vld [vmem:[%s3714_s12 + $0x58] sm:$0xff] }
 0x484   :  { %1831 = vmatprep.subr.mxu1 %v2557_v31  ;;  %2488 = vmatprep.subr.mxu0 %v1901_v49 }
 0x485   :  { %1832 = vmatpush2.msra.mxu1 %v1742_v51  ;;  %2489 = vmatpush3.msra.mxu0 %v1901_v49 }
 0x486   :  { %1833 = vmatprep.subr.mxu1 %v2557_v31 }
 0x487   :  { %1834 = vmatpush2.msra.mxu1 %v1741_v53 }
 0x488   :  { %1835 = vmatprep.subr.mxu1 %v2557_v31 }
 0x489   :  { %1836 = vmatpush2.msra.mxu1 %v1740_v54 }
 0x48a   :  { %1837 = vmatprep.subr.mxu1 %v2557_v31 }
 0x48b   :  { %1838 = vmatpush2.msra.mxu1 %v1739_v55 }
 0x48c   :  { %1839 = vmatprep.subr.mxu1 %v2557_v31 }
 0x48d   :  { %1840 = vmatpush2.msra.mxu1 %v1738_v56  ;;  %v1900_v56 = vld [vmem:[%s3714_s12 + $0x50] sm:$0xff] }
 0x48e   :  { %2490 = vmatprep.subr.mxu0 %v1900_v56 }
 0x48f   :  { %2491 = vmatpush3.msra.mxu0 %v1900_v56 }
 0x524   :  { %v2470_v57 = vpop.f32.mrf.mxu0 }
 0x525   :  { %v1593_v17 = vadd.f32 %v2470_v57, %v2213_v50 }
 0x526   :  { %v1587_v58 = vpop.f32.mrf.mxu0 }
 0x527   :  { %v1627_v62 = vmax.f32 %v1593_v17, 0.0  ;;  %v1588_v63 = vadd.f32 %v2213_v50, %v1587_v58 }
 0x529   :  { %v3493_v13 = vmax.f32 %v1588_v63, 0.0  ;;  %1692 = vrot.lane.b32.xlu1 %v1627_v62, %s2556_s8  ;;  %v1635_v48 = vrot.slane %v1627_v62, 7  ;;  %v1659_v3 = vrot.slane %v1627_v62, 1  ;;  %v1899_v62 = vld [vmem:[%s3714_s12 + $0x48] sm:$0xff]  ;;  %v1898_v63 = vld [vmem:[%s3714_s12 + $0x40] sm:$0xff] }
 0x52a   :  { %2492 = vmatprep.subr.mxu0 %v1899_v62 }
 0x52b   :  { %v1634_v5 = vrot.slane %v3493_v13, 7  ;;  %v1658_v40 = vrot.slane %v3493_v13, 1  ;;  %1690 = vrot.lane.b32.xlu0 %v3493_v13, %s2556_s8  ;;  %2493 = vmatpush3.msra.mxu0 %v1899_v62  ;;  %v1897_v13 = vld [vmem:[%s3714_s12 + $0x38] sm:$0xff]  ;;  %v2026_v62 = vld [vmem:[%s3716_s14] sm:$0xff] }
 0x52c   :  { %2494 = vmatprep.subr.mxu0 %v1898_v63 }
 0x52d   :  { %v2473_v0 = vpop.f32.mrf.mxu0  ;;  %v1672_v2 = vsel %vm231_vm1, %v1658_v40, %v1659_v3  ;;  %v3508_v8 = vsel %vm190_vm2, %v1634_v5, %v1635_v48  ;;  %2495 = vmatpush3.msra.mxu0 %v1898_v63  ;;  %v2231_v63 = vld [vmem:[%s3717_s13] ss:$0 sm:$0xff] }
 0x52e   :  { %v1603_v10 = vadd.f32 %v2473_v0, %v2213_v50  ;;  %2223 = vmatprep.mubr.msk.f32.mxu1 %vm1468_vm15, %v1672_v2  ;;  %2496 = vmatprep.subr.mxu0 %v1897_v13 }
 0x52f   :  { %v1597_v11 = vpop.f32.mrf.mxu0  ;;  %2497 = vmatpush3.msra.mxu0 %v1897_v13 }
 0x530   :  { %v1629_v7 = vmax.f32 %v1603_v10, 0.0  ;;  %v1598_v12 = vadd.f32 %v2213_v50, %v1597_v11  ;;  %2498 = vmatprep.subr.mxu0 %v1896_v4 }
 0x531   :  { %2499 = vmatpush3.msra.mxu0 %v1896_v4 }
 0x532   :  { %v1628_v14 = vmax.f32 %v1598_v12, 0.0  ;;  %1696 = vrot.lane.b32.xlu1 %v1629_v7, %s2556_s8  ;;  %v1661_v60 = vrot.slane %v1629_v7, 1  ;;  %v1637_v16 = vrot.slane %v1629_v7, 7 }
 0x534   :  { %v1636_v15 = vrot.slane %v1628_v14, 7  ;;  %v1660_v1 = vrot.slane %v1628_v14, 1  ;;  %1694 = vrot.lane.b32.xlu0 %v1628_v14, %s2556_s8 }
 0x535   :  { %v2476_v19 = vpop.f32.mrf.mxu0 }
 0x536   :  { %v1613_v20 = vadd.f32 %v2476_v19, %v2213_v50  ;;  %v3515_v21 = vsel %vm231_vm1, %v1659_v3, %v1660_v1  ;;  %v3519_v22 = vsel %vm231_vm1, %v1660_v1, %v1661_v60  ;;  %v3523_v24 = vsel %vm190_vm2, %v1635_v48, %v1636_v15  ;;  %v1895_v48 = vld [vmem:[%s3714_s12 + $0x28] sm:$0xff]  ;;  %v1894_v3 = vld [vmem:[%s3714_s12 + $0x20] sm:$0xff] }
 0x537   :  { %v1607_v9 = vpop.f32.mrf.mxu0  ;;  %v3527_v25 = vsel %vm190_vm2, %v1636_v15, %v1637_v16  ;;  %2500 = vmatprep.subr.mxu0 %v1895_v48 }
 0x538   :  { %v1631_v59 = vmax.f32 %v1613_v20, 0.0  ;;  %v1608_v28 = vadd.f32 %v2213_v50, %v1607_v9  ;;  %2501 = vmatpush3.msra.mxu0 %v1895_v48  ;;  %v1890_v9 = vld [vmem:[%s3714_s12] sm:$0xff] }
 0x539   :  { %2502 = vmatprep.subr.mxu0 %v1894_v3 }
 0x53a   :  { %v1630_v29 = vmax.f32 %v1608_v28, 0.0  ;;  %1700 = vrot.lane.b32.xlu1 %v1631_v59, %s2556_s8  ;;  %v1663_v30 = vrot.slane %v1631_v59, 1  ;;  %v1639_v23 = vrot.slane %v1631_v59, 7  ;;  %2503 = vmatpush3.msra.mxu0 %v1894_v3 }
 0x53c   :  { %v1638_v31 = vrot.slane %v1630_v29, 7  ;;  %v1662_v61 = vrot.slane %v1630_v29, 1  ;;  %1698 = vrot.lane.b32.xlu0 %v1630_v29, %s2556_s8 }
 0x53d   :  { %v2479_v33 = vpop.f32.mrf.mxu0 }
 0x53e   :  { %v1623_v32 = vadd.f32 %v2479_v33, %v2213_v50  ;;  %v3539_v36 = vsel %vm231_vm1, %v1661_v60, %v1662_v61  ;;  %v3543_v26 = vsel %vm231_vm1, %v1662_v61, %v1663_v30  ;;  %v3547_v37 = vsel %vm190_vm2, %v1637_v16, %v1638_v31 }
 0x53f   :  { %v1617_v38 = vpop.f32.mrf.mxu0  ;;  %v3551_v39 = vsel %vm190_vm2, %v1638_v31, %v1639_v23  ;;  %v1677_v12 = vsel %vm2714_vm3, 0.0, %v3539_v36  ;;  %v1654_v60 = vsel %vm2834_vm9, 0.0, %v3547_v37 }
 0x540   :  { %v1633_v42 = vmax.f32 %v1623_v32, 0.0  ;;  %v1618_v43 = vadd.f32 %v2213_v50, %v1617_v38 }
 0x542   :  { %v1641_v45 = vrot.slane %v1633_v42, 7  ;;  %v1665_v47 = vrot.slane %v1633_v42, 1  ;;  %v1632_v18 = vmax.f32 %v1618_v43, 0.0  ;;  %1704 = vrot.lane.b32.xlu1 %v1633_v42, %s2556_s8 }
 0x544   :  { %v1640_v51 = vrot.slane %v1632_v18, 7  ;;  %v1664_v53 = vrot.slane %v1632_v18, 1  ;;  %1702 = vrot.lane.b32.xlu0 %v1632_v18, %s2556_s8  ;;  %v1649_v54 = vsel %vm190_vm2, %v1641_v45, %v1634_v5  ;;  %v3572_v55 = vsel %vm231_vm1, %v1665_v47, %v1658_v40 }
 0x545   :  { %v1650_v40 = vsel %vm2814_vm5, 0.0, %v1649_v54  ;;  %v1681_v6 = vsel %vm2775_vm4, 0.0, %v3572_v55 }
 0x546   :  { %v1667_v50 = vsel %vm231_vm1, %v1663_v30, %v1664_v53  ;;  %v1666_v57 = vsel %vm231_vm1, %v1664_v53, %v1665_v47  ;;  %v1643_v17 = vsel %vm190_vm2, %v1639_v23, %v1640_v51  ;;  %v1642_v58 = vsel %vm190_vm2, %v1640_v51, %v1641_v45 }
 0x547   :  { %vm2164_vm1 = vcmask 15360  }
 0x59b   :  { %v1693_v2 = vpop.permute.xlu1 %1692 }
 0x59c   :  { %v1715_v10 = vsel %vm1468_vm15, %v3508_v8, %v1693_v2 }
 0x59d   :  { %v1691_v5 = vpop.permute.xlu0 %1690 }
 0x59e   :  { %v1714_v0 = vsel %vm1468_vm15, %v1650_v40, %v1691_v5 }
 0x59f   :  { %1842 = vmatmul.mubr.f32.vlgmr.msra.gmra.mxu1 %v1714_v0 }
 0x5a0   :  { %2224 = vmatprep.mubr.msk.f32.mxu1 %vm1468_vm15, %v3515_v21 }
 0x5a3   :  { %1847 = vmatmul.mubr.f32.gmra.mxu1 %v1715_v10 }
 0x5a4   :  { %2225 = vmatprep.mubr.msk.f32.mxu1 %vm1468_vm15, %v3519_v22  ;;  %v1697_v52 = vpop.permute.xlu1 %1696  ;;  %v1893_v22 = vld [vmem:[%s3714_s12 + $0x18] sm:$0xff] }
 0x5a5   :  { %v1717_v14 = vsel %vm1468_vm15, %v3527_v25, %v1697_v52  ;;  %2504 = vmatprep.subr.mxu0 %v1893_v22  ;;  %v2222_v25 = vld [vmem:[%s3715_s11] ss:$0 sm:$0xff] }
 0x5a6   :  { %v1695_v11 = vpop.permute.xlu0 %1694  ;;  %2505 = vmatpush3.msra.mxu0 %v1893_v22  ;;  %v2232_v22 = vld [vmem:[%s3718_s15] ss:$0 sm:$0xff] }
 0x5a7   :  { %v1716_v7 = vsel %vm1468_vm15, %v3523_v24, %v1695_v11  ;;  %v1892_v24 = vld [vmem:[%s3714_s12 + $0x10] sm:$0xff] }
 0x5a8   :  { %1852 = vmatmul.mubr.f32.gmra.mxu1 %v1716_v7  ;;  %2506 = vmatprep.subr.mxu0 %v1892_v24 }
 0x5a9   :  { %2226 = vmatprep.mubr.msk.f32.mxu1 %vm1468_vm15, %v1677_v12  ;;  %2507 = vmatpush3.msra.mxu0 %v1892_v24 }
 0x5aa   :  { %2508 = vmatprep.subr.mxu0 %v1891_v46 }
 0x5ab   :  { %2509 = vmatpush3.msra.mxu0 %v1891_v46 }
 0x5ac   :  { %1857 = vmatmul.mubr.f32.gmra.mxu1 %v1717_v14  ;;  %v1701_v1 = vpop.permute.xlu1 %1700  ;;  %2510 = vmatprep.subr.mxu0 %v1890_v9 }
 0x5ad   :  { %2227 = vmatprep.mubr.msk.f32.mxu1 %vm1468_vm15, %v3543_v26  ;;  %v1719_v27 = vsel %vm1468_vm15, %v3551_v39, %v1701_v1  ;;  %2511 = vmatpush3.msra.mxu0 %v1890_v9 }
 0x5ae   :  { %v1699_v8 = vpop.permute.xlu0 %1698 }
 0x5af   :  { %v1718_v15 = vsel %vm1468_vm15, %v1654_v60, %v1699_v8 }
 0x5b0   :  { %1862 = vmatmul.mubr.f32.gmra.mxu1 %v1718_v15 }
 0x5b1   :  { %2228 = vmatprep.mubr.msk.f32.mxu1 %vm1468_vm15, %v1667_v50 }
 0x5b4   :  { %1867 = vmatmul.mubr.f32.gmra.mxu1 %v1719_v27  ;;  %v1705_v20 = vpop.permute.xlu1 %1704 }
 0x5b5   :  { %2229 = vmatprep.mubr.msk.f32.mxu1 %vm1468_vm15, %v1666_v57  ;;  %v1721_v21 = vsel %vm1468_vm15, %v1642_v58, %v1705_v20  ;;  %v2027_v58 = vld [vmem:[%s3716_s14 + $0x8] sm:$0xff] }
 0x5b6   :  { %v1703_v16 = vpop.permute.xlu0 %1702  ;;  %2524 = vmatprep.subr.mxu0 %v2027_v58 }
 0x5b7   :  { %v1720_v19 = vsel %vm1468_vm15, %v1643_v17, %v1703_v16 }
 0x5b8   :  { %1872 = vmatmul.mubr.f32.gmra.mxu1 %v1720_v19 }
 0x5b9   :  { %2230 = vmatprep.mubr.msk.f32.mxu1 %vm1468_vm15, %v1681_v6 }
 0x5bc   :  { %1877 = vmatmul.mubr.f32.gmra.mxu1 %v1721_v21 }
 0x65f   :  { %v1843_v59 = vpop.f32.mrf.mxu1 }
 0x660   :  { %v1844_v28 = vadd.f32 %v2222_v25, %v1843_v59 }
 0x661   :  { %v1845_v29 = vpop.f32.mrf.mxu1 }
 0x662   :  { %v1882_v30 = vmax.f32 %v1844_v28, 0.0 }
 0x663   :  { %v1848_v31 = vpop.f32.mrf.mxu1 }
 0x664   :  { %v1849_v61 = vadd.f32 %v2222_v25, %v1848_v31  ;;  %2512 = vmatprep.mubr.f32.mxu0 %v1882_v30 }
 0x665   :  { %v1850_v23 = vpop.f32.mrf.mxu1 }
 0x666   :  { %v1883_v33 = vmax.f32 %v1849_v61, 0.0 }
 0x668   :  { %v1853_v34 = vpop.f32.mrf.mxu1  ;;  %2513 = vmatmul.mubr.f32.vlgmr.msra.gmra.mxu0 %v1883_v33 }
 0x669   :  { %v1854_v35 = vadd.f32 %v2222_v25, %v1853_v34  ;;  %2525 = vmatpush3.msra.mxu0 %v2027_v58 }
 0x66a   :  { %v1855_v32 = vpop.f32.mrf.mxu1  ;;  %2526 = vmatprep.subr.mxu0 %v2026_v62 }
 0x66b   :  { %v1884_v36 = vmax.f32 %v1854_v35, 0.0  ;;  %2527 = vmatpush3.msra.mxu0 %v2026_v62 }
 0x66c   :  { %v1858_v26 = vpop.f32.mrf.mxu1 }
 0x66d   :  { %v1859_v37 = vadd.f32 %v2222_v25, %v1858_v26  ;;  %2515 = vmatprep.mubr.f32.mxu0 %v1884_v36 }
 0x66e   :  { %v1860_v38 = vpop.f32.mrf.mxu1 }
 0x66f   :  { %v1885_v39 = vmax.f32 %v1859_v37, 0.0 }
 0x670   :  { %v1863_v41 = vpop.f32.mrf.mxu1 }
 0x671   :  { %v1864_v42 = vadd.f32 %v2222_v25, %v1863_v41  ;;  %2516 = vmatmul.mubr.f32.gmra.mxu0 %v1885_v39 }
 0x672   :  { %v1865_v43 = vpop.f32.mrf.mxu1 }
 0x673   :  { %v1886_v44 = vmax.f32 %v1864_v42, 0.0 }
 0x674   :  { %v1868_v45 = vpop.f32.mrf.mxu1 }
 0x675   :  { %v1869_v47 = vadd.f32 %v2222_v25, %v1868_v45  ;;  %2518 = vmatprep.mubr.f32.mxu0 %v1886_v44 }
 0x676   :  { %v1870_v18 = vpop.f32.mrf.mxu1 }
 0x677   :  { %v1887_v49 = vmax.f32 %v1869_v47, 0.0 }
 0x678   :  { %v1873_v51 = vpop.f32.mrf.mxu1 }
 0x679   :  { %v1874_v53 = vadd.f32 %v2222_v25, %v1873_v51  ;;  %2519 = vmatmul.mubr.f32.gmra.mxu0 %v1887_v49 }
 0x67a   :  { %v1875_v54 = vpop.f32.mrf.mxu1 }
 0x67b   :  { %v1888_v55 = vmax.f32 %v1874_v53, 0.0 }
 0x67c   :  { %v1878_v56 = vpop.f32.mrf.mxu1 }
 0x67d   :  { %v1879_v50 = vadd.f32 %v2222_v25, %v1878_v56  ;;  %2521 = vmatprep.mubr.f32.mxu0 %v1888_v55 }
 0x67e   :  { %v1880_v57 = vpop.f32.mrf.mxu1 }
 0x67f   :  { %v1889_v17 = vmax.f32 %v1879_v50, 0.0 }
 0x681   :  { %2522 = vmatmul.mubr.f32.gmra.mxu0 %v1889_v17 }
 0x728   :  { %v2514_v13 = vpop.f32.mrf.mxu0 }
 0x729   :  { %v1985_v4 = vadd.f32 %v2514_v13, %v2231_v63 }
 0x72a   :  { %v1979_v48 = vpop.f32.mrf.mxu0 }
 0x72b   :  { %v1980_v3 = vadd.f32 %v2231_v63, %v1979_v48  ;;  %v2019_v40 = vmax.f32 %v1985_v4, 0.0 }
 0x72d   :  { %v2018_v5 = vmax.f32 %v1980_v3, 0.0 }
 0x72f   :  { %2528 = vmatprep.mubr.msk.f32.mxu0 %vm609_vm14, %v2018_v5 }
 0x730   :  { %2529 = vmatmul.mubr.msk.f32.vlgmr.msra.gmra.mxu0 %vm609_vm14, %v2019_v40 }
 0x731   :  { %v2517_v0 = vpop.f32.mrf.mxu0 }
 0x732   :  { %v1995_v2 = vadd.f32 %v2517_v0, %v2231_v63 }
 0x733   :  { %v1989_v10 = vpop.f32.mrf.mxu0 }
 0x734   :  { %v1990_v11 = vadd.f32 %v2231_v63, %v1989_v10  ;;  %v2021_v52 = vmax.f32 %v1995_v2, 0.0 }
 0x736   :  { %v2020_v7 = vmax.f32 %v1990_v11, 0.0 }
 0x738   :  { %2531 = vmatprep.mubr.msk.f32.mxu0 %vm609_vm14, %v2020_v7 }
 0x739   :  { %v2520_v12 = vpop.f32.mrf.mxu0  ;;  %2532 = vmatmul.mubr.msk.f32.gmra.mxu0 %vm609_vm14, %v2021_v52 }
 0x73a   :  { %v2005_v14 = vadd.f32 %v2520_v12, %v2231_v63 }
 0x73b   :  { %v1999_v8 = vpop.f32.mrf.mxu0 }
 0x73c   :  { %v2000_v60 = vadd.f32 %v2231_v63, %v1999_v8  ;;  %v2023_v1 = vmax.f32 %v2005_v14, 0.0 }
 0x73e   :  { %v2022_v15 = vmax.f32 %v2000_v60, 0.0 }
 0x740   :  { %2534 = vmatprep.mubr.msk.f32.mxu0 %vm609_vm14, %v2022_v15 }
 0x741   :  { %v2523_v27 = vpop.f32.mrf.mxu0  ;;  %2535 = vmatmul.mubr.msk.f32.gmra.mxu0 %vm609_vm14, %v2023_v1 }
 0x742   :  { %v2015_v16 = vadd.f32 %v2523_v27, %v2231_v63 }
 0x743   :  { %v2009_v19 = vpop.f32.mrf.mxu0 }
 0x744   :  { %v2010_v20 = vadd.f32 %v2231_v63, %v2009_v19  ;;  %v2025_v21 = vmax.f32 %v2015_v16, 0.0 }
 0x746   :  { %v2024_v6 = vmax.f32 %v2010_v20, 0.0 }
 0x748   :  { %2537 = vmatprep.mubr.msk.f32.mxu0 %vm609_vm14, %v2024_v6 }
 0x749   :  { %2538 = vmatmul.mubr.msk.f32.gmra.mxu0 %vm609_vm14, %v2025_v21 }
 0x7f0   :  { %v2530_v24 = vpop.f32.mrf.mxu0 }
 0x7f1   :  { %v2131_v46 = vadd.f32 %v2530_v24, %v2232_v22 }
 0x7f2   :  { %v2125_v9 = vpop.f32.mrf.mxu0 }
 0x7f3   :  { %2166 = vst.msk [vmem:[%s3719_s16 + $0x8] sm:$0xff] %vm2164_vm1, %v2131_v46  ;;  %v2126_v25 = vadd.f32 %v2232_v22, %v2125_v9 }
 0x7f5   :  { %2165 = vst.msk [vmem:[%s3719_s16] sm:$0xff] %vm2164_vm1, %v2126_v25 }
 0x7f9   :  { %v2533_v59 = vpop.f32.mrf.mxu0 }
 0x7fa   :  { %v2141_v28 = vadd.f32 %v2533_v59, %v2232_v22 }
 0x7fb   :  { %v2135_v29 = vpop.f32.mrf.mxu0 }
 0x7fc   :  { %2168 = vst.msk [vmem:[%s3719_s16 + $0x18] sm:$0xff] %vm2164_vm1, %v2141_v28  ;;  %v2136_v30 = vadd.f32 %v2232_v22, %v2135_v29 }
 0x7fe   :  { %2167 = vst.msk [vmem:[%s3719_s16 + $0x10] sm:$0xff] %vm2164_vm1, %v2136_v30 }
 0x801   :  { %v2536_v31 = vpop.f32.mrf.mxu0 }
 0x802   :  { %v2151_v61 = vadd.f32 %v2536_v31, %v2232_v22 }
 0x803   :  { %v2145_v23 = vpop.f32.mrf.mxu0 }
 0x804   :  { %2170 = vst.msk [vmem:[%s3719_s16 + $0x28] sm:$0xff] %vm2164_vm1, %v2151_v61  ;;  %v2146_v33 = vadd.f32 %v2232_v22, %v2145_v23 }
 0x806   :  { %2169 = vst.msk [vmem:[%s3719_s16 + $0x20] sm:$0xff] %vm2164_vm1, %v2146_v33 }
 0x809   :  { %v2539_v34 = vpop.f32.mrf.mxu0 }
 0x80a   :  { %v2161_v35 = vadd.f32 %v2539_v34, %v2232_v22 }
 0x80b   :  { %v2155_v32 = vpop.f32.mrf.mxu0 }
 0x80c   :  { %2172 = vst.msk [vmem:[%s3719_s16 + $0x38] sm:$0xff] %vm2164_vm1, %v2161_v35  ;;  %v2156_v36 = vadd.f32 %v2232_v22, %v2155_v32 }
 0x80e   :  { %2171 = vst.msk [vmem:[%s3719_s16 + $0x30] sm:$0xff] %vm2164_vm1, %v2156_v36 }

</bundles_post_ra>
